<compile_context>
chip_gen: v7x
topology: tpu7x:2x2x1
jax: 0.10.0
libtpu: 0.0.40
codegen_flags: <defaults>
</compile_context>

<pallas_src>
import functools

import jax
import jax.numpy as jnp
from jax import lax
from jax.experimental import pallas as pl
from jax.experimental.pallas import tpu as pltpu  # noqa: F401  (kept for future tuning knobs)

HISTORY_LENGTH = 4
BN_EPS = 1e-5


# ----------------------------- Pallas kernels ------------------------------ #
def _conv_gemm_kernel(x_ref, w_ref, b_ref, o_ref):
    # out = relu(x @ w + b); BN scale/shift already folded into w / b.
    # x, w are bf16; accumulate in f32; epilogue in f32; store bf16.
    acc = jnp.dot(x_ref[...], w_ref[...], preferred_element_type=jnp.float32)
    o_ref[...] = jnp.maximum(acc + b_ref[...], 0.0).astype(o_ref.dtype)


def _tail_kernel(p3_ref, w3_ref, b3_ref, w1_ref, b1_ref, w2_ref, b2_ref,
                 o_ref, *, spatial):
    # Fused conv3(+BN+ReLU) -> fc1(+ReLU) -> fc2.
    #   p3_ref : (S, N, k*k*C2)  spatial-major conv3 patches (bf16)
    #   w3_ref : (k*k*C2, C3)    BN-folded conv3 weight (bf16), b3_ref (1, C3) f32
    #   w1_ref : (S, C3, H)      fc1 weight, spatial-major rows (bf16), b1 (1, H)
    #   w2_ref : (H, A)          fc2 weight (bf16), b2 (1, A) f32
    # The per-spatial loop uses only leading-dim indexing (no in-kernel reshape
    # or strided slicing); S is tiny (convh*convw = 4) so it is fully unrolled.
    h = b1_ref[...]                                             # (1, H) f32
    for s in range(spatial):
        ps = p3_ref[s]                                          # (N, K) bf16
        y = jnp.dot(ps, w3_ref[...], preferred_element_type=jnp.float32)
        y = jnp.maximum(y + b3_ref[...], 0.0)                   # conv3 BN+ReLU
        h = h + jnp.dot(y.astype(w1_ref.dtype), w1_ref[s],
                        preferred_element_type=jnp.float32)     # fc1 partial
    h = jnp.maximum(h, 0.0)                                     # fc1 ReLU
    q = jnp.dot(h.astype(w2_ref.dtype), w2_ref[...],
                preferred_element_type=jnp.float32)
    o_ref[...] = (q + b2_ref[...]).astype(o_ref.dtype)


def conv_gemm(x, w, b):
    """relu(x @ w + b) as a single VMEM-resident kernel (no grid)."""
    M, K = x.shape
    K2, N = w.shape
    assert K == K2 and b.shape == (1, N)
    return pl.pallas_call(
        _conv_gemm_kernel,
        out_shape=jax.ShapeDtypeStruct((M, N), jnp.bfloat16),
    )(x, w, b)


def tail_fused(p3, w3, b3, fc1_w, fc1_b, fc2_w, fc2_b):
    """fc2(relu(fc1(relu(conv3_gemm(p3))))) in one Pallas kernel."""
    S, N, K = p3.shape
    C3 = w3.shape[1]
    H = fc1_w.shape[2]
    A = fc2_w.shape[1]
    assert w3.shape == (K, C3) and fc1_w.shape == (S, C3, H)
    assert fc2_w.shape == (H, A) and fc1_b.shape == (1, H) and fc2_b.shape == (1, A)
    return pl.pallas_call(
        functools.partial(_tail_kernel, spatial=S),
        out_shape=jax.ShapeDtypeStruct((N, A), jnp.float32),
    )(p3, w3, b3, fc1_w, fc1_b, fc2_w, fc2_b)


# ------------------------------- JAX glue ---------------------------------- #
def conv2d_size_out(size, kernel_size=5, stride=2):
    return (size - (kernel_size - 1) - 1) // stride + 1


def im2col_nhwc(x, k=5, s=2):
    """x: (N, H, W, C) -> (N*OH*OW, k*k*C); per-patch ordering is (kh, kw, c)."""
    N, H, W, C = x.shape
    oh = (H - k) // s + 1
    ow = (W - k) // s + 1
    cols = []
    for i in range(k):
        for j in range(k):
            cols.append(x[:, i:i + s * (oh - 1) + 1:s,
                             j:j + s * (ow - 1) + 1:s, :])       # (N, oh, ow, C)
    patches = jnp.concatenate(cols, axis=-1)                     # (N, oh, ow, k*k*C)
    return patches.reshape(N * oh * ow, k * k * C), oh, ow


def _conv_gemm_params(conv_w, conv_b, gamma, beta, mean, var):
    """Fold BN into the conv; lay out as (k*k*cin, cout) bf16 GEMM weight. No padding."""
    cout, cin, kh, kw = conv_w.shape
    scale = gamma / jnp.sqrt(var + BN_EPS)
    w = conv_w.transpose(2, 3, 1, 0) * scale[None, None, None, :]   # (kh,kw,cin,cout)
    w = w.reshape(kh * kw * cin, cout).astype(jnp.bfloat16)
    b = ((conv_b - mean) * scale + beta).reshape(1, cout).astype(jnp.float32)
    return w, b


def prepare_params(p, h, w):
    """One-time weight preprocessing: BN fold, layout permute, bf16 cast."""
    convw = conv2d_size_out(conv2d_size_out(conv2d_size_out(w)))
    convh = conv2d_size_out(conv2d_size_out(conv2d_size_out(h)))
    eff = {}
    eff["w1"], eff["b1"] = _conv_gemm_params(
        p["conv1_w"], p["conv1_b"], p["bn1_g"], p["bn1_b"], p["bn1_m"], p["bn1_v"])
    eff["w2"], eff["b2"] = _conv_gemm_params(
        p["conv2_w"], p["conv2_b"], p["bn2_g"], p["bn2_b"], p["bn2_m"], p["bn2_v"])
    eff["w3"], eff["b3"] = _conv_gemm_params(
        p["conv3_w"], p["conv3_b"], p["bn3_g"], p["bn3_b"], p["bn3_m"], p["bn3_v"])

    # fc1: PyTorch weight is (H, C3*convh*convw) over NCHW-flattened (c, oh, ow)
    # features.  The tail kernel consumes it spatial-major as (S, C3, H) so each
    # spatial position's contribution is a plain leading-dim-indexed dot.
    c3 = p["conv3_w"].shape[0]
    fc1_w = p["fc1_w"].reshape(-1, c3, convh, convw)     # (H, C3, oh, ow)
    fc1_w = fc1_w.transpose(2, 3, 1, 0)                  # (oh, ow, C3, H)
    eff["fc1_w"] = fc1_w.reshape(convh * convw, c3, -1).astype(jnp.bfloat16)
    eff["fc1_b"] = p["fc1_b"].reshape(1, -1).astype(jnp.float32)

    # fc2: pre-transpose only.  No lane padding -- a (batch, action_size) masked
    # store is negligible and padding would only add weight DMA.
    eff["fc2_w"] = p["fc2_w"].T.astype(jnp.bfloat16)     # (H, A)
    eff["fc2_b"] = p["fc2_b"].reshape(1, -1).astype(jnp.float32)
    return eff


@jax.jit
def net_forward(eff, state):
    n = state.shape[0]
    x = state.transpose(0, 2, 3, 1).astype(jnp.bfloat16)   # NCHW -> NHWC once, bf16
    c1 = eff["w1"].shape[1]
    c2 = eff["w2"].shape[1]

    p1, oh1, ow1 = im2col_nhwc(x)
    a1 = conv_gemm(p1, eff["w1"], eff["b1"]).reshape(n, oh1, ow1, c1)
    p2, oh2, ow2 = im2col_nhwc(a1)
    a2 = conv_gemm(p2, eff["w2"], eff["b2"]).reshape(n, oh2, ow2, c2)
    p3, oh3, ow3 = im2col_nhwc(a2)
    # Reorder conv3 patches to spatial-major (S, N, K) for the fused tail kernel.
    p3 = p3.reshape(n, oh3 * ow3, p3.shape[1]).transpose(1, 0, 2)
    return tail_fused(p3, eff["w3"], eff["b3"],
                      eff["fc1_w"], eff["fc1_b"], eff["fc2_w"], eff["fc2_b"])


# Pure-JAX f32 reference for correctness checking (original parameter layout).
def ref_forward(p, state):
    def conv(x, w, b):
        y = lax.conv_general_dilated(x, w, (2, 2), "VALID",
                                     dimension_numbers=("NCHW", "OIHW", "NCHW"))
        return y + b[None, :, None, None]

    def bn(x, g, bb, m, v):
        return ((x - m[None, :, None, None])
                / jnp.sqrt(v[None, :, None, None] + BN_EPS)
                * g[None, :, None, None] + bb[None, :, None, None])

    x = jax.nn.relu(bn(conv(state, p["conv1_w"], p["conv1_b"]),
                       p["bn1_g"], p["bn1_b"], p["bn1_m"], p["bn1_v"]))
    x = jax.nn.relu(bn(conv(x, p["conv2_w"], p["conv2_b"]),
                       p["bn2_g"], p["bn2_b"], p["bn2_m"], p["bn2_v"]))
    x = jax.nn.relu(bn(conv(x, p["conv3_w"], p["conv3_b"]),
                       p["bn3_g"], p["bn3_b"], p["bn3_m"], p["bn3_v"]))
    flat = x.reshape(x.shape[0], -1)
    h = jax.nn.relu(flat @ p["fc1_w"].T + p["fc1_b"])
    return h @ p["fc2_w"].T + p["fc2_b"]


def init_params(key, h, w, action_size):
    convw = conv2d_size_out(conv2d_size_out(conv2d_size_out(w)))
    convh = conv2d_size_out(conv2d_size_out(conv2d_size_out(h)))
    fc_in = convh * convw * 32

    ks = jax.random.split(key, 16)
    f32 = jnp.float32
    p = {
        "conv1_w": 0.05 * jax.random.normal(ks[0], (16, HISTORY_LENGTH, 5, 5), f32),
        "conv1_b": 0.05 * jax.random.normal(ks[1], (16,), f32),
        "bn1_g": 1.0 + 0.1 * jax.random.normal(ks[2], (16,), f32),
        "bn1_b": 0.1 * jax.random.normal(ks[3], (16,), f32),
        "bn1_m": 0.1 * jax.random.normal(ks[4], (16,), f32),
        "bn1_v": 1.0 + 0.1 * jax.random.uniform(ks[5], (16,), f32),
        "conv2_w": 0.05 * jax.random.normal(ks[6], (32, 16, 5, 5), f32),
        "conv2_b": 0.05 * jax.random.normal(ks[7], (32,), f32),
        "bn2_g": 1.0 + 0.1 * jax.random.normal(ks[8], (32,), f32),
        "bn2_b": 0.1 * jax.random.normal(ks[9], (32,), f32),
        "bn2_m": 0.1 * jax.random.normal(ks[10], (32,), f32),
        "bn2_v": 1.0 + 0.1 * jax.random.uniform(ks[11], (32,), f32),
        "conv3_w": 0.05 * jax.random.normal(ks[12], (32, 32, 5, 5), f32),
        "conv3_b": 0.05 * jax.random.normal(ks[13], (32,), f32),
        "bn3_g": 1.0 + 0.1 * jax.random.normal(ks[14], (32,), f32),
        "bn3_b": 0.1 * jax.random.normal(ks[15], (32,), f32),
        "bn3_m": jnp.zeros((32,), f32),
        "bn3_v": jnp.ones((32,), f32),
    }
    k_fc = jax.random.split(jax.random.fold_in(key, 7), 4)
    p["fc1_w"] = 0.05 * jax.random.normal(k_fc[0], (128, fc_in), f32)   # (out, in)
    p["fc1_b"] = 0.05 * jax.random.normal(k_fc[1], (128,), f32)
    p["fc2_w"] = 0.05 * jax.random.normal(k_fc[2], (action_size, 128), f32)
    p["fc2_b"] = 0.05 * jax.random.normal(k_fc[3], (action_size,), f32)
    return p


if __name__ == "__main__":
    key = jax.random.PRNGKey(0)
    batch, H, W, action_size = 2, 40, 40, 6   # 40 -> 18 -> 7 -> 2 after 3 convs
    k_param, k_in = jax.random.split(key)
    params = init_params(k_param, H, W, action_size)
    eff = prepare_params(params, H, W)                   # one-time preprocessing
    state = jax.random.normal(k_in, (batch, HISTORY_LENGTH, H, W), jnp.float32)

    out = jax.block_until_ready(net_forward(eff, state))
    ref = jax.block_until_ready(ref_forward(params, state))

    assert out.shape == (batch, action_size)
    # bf16 matmul operands vs. an f32 reference -> looser tolerance (per review).
    if not jnp.allclose(out, ref, atol=3e-2, rtol=3e-2):
        raise AssertionError("Pallas output does not match reference")
    print("KERNEL_OK")
</pallas_src>

<mosaic_0001>
module attributes {stable_mosaic.version = 11 : i64} {
  func.func @_conv_gemm_kernel(%arg0: memref<648x100xbf16, #tpu.memory_space<vmem>>, %arg1: memref<100x16xbf16, #tpu.memory_space<vmem>>, %arg2: memref<1x16xf32, #tpu.memory_space<vmem>>, %arg3: memref<648x16xbf16, #tpu.memory_space<vmem>>) attributes {dimension_semantics = [], scalar_prefetch = 0 : i64, scratch_operands = 0 : i64, tpu.core_type = #tpu.core_type<tc>} {
    %c0 = arith.constant 0 : index
    %c0_0 = arith.constant 0 : index
    %0 = vector.load %arg0[%c0, %c0_0] : memref<648x100xbf16, #tpu.memory_space<vmem>>, vector<648x100xbf16>
    %c0_1 = arith.constant 0 : index
    %c0_2 = arith.constant 0 : index
    %1 = vector.load %arg1[%c0_1, %c0_2] : memref<100x16xbf16, #tpu.memory_space<vmem>>, vector<100x16xbf16>
    %cst = arith.constant dense<0.000000e+00> : vector<648x16xf32>
    %2 = tpu.matmul %0, %1, %cst {dimension_numbers = #tpu.dot_dimension_numbers<[1], [0], [0], [1], [0, 0, 1, 1], [], []>} : vector<648x100xbf16>, vector<100x16xbf16>, vector<648x16xf32> -> vector<648x16xf32>
    %c0_3 = arith.constant 0 : index
    %c0_4 = arith.constant 0 : index
    %3 = vector.load %arg2[%c0_3, %c0_4] : memref<1x16xf32, #tpu.memory_space<vmem>>, vector<1x16xf32>
    %4 = vector.broadcast %3 : vector<1x16xf32> to vector<648x16xf32>
    %5 = arith.addf %2, %4 : vector<648x16xf32>
    %cst_5 = arith.constant 0.000000e+00 : f32
    %6 = vector.broadcast %cst_5 : f32 to vector<648x16xf32>
    %7 = arith.maximumf %5, %6 : vector<648x16xf32>
    %8 = arith.truncf %7 : vector<648x16xf32> to vector<648x16xbf16>
    %c0_6 = arith.constant 0 : index
    %c0_7 = arith.constant 0 : index
    %9 = vector.load %arg3[%c0_6, %c0_7] : memref<648x16xbf16, #tpu.memory_space<vmem>>, vector<648x16xbf16>
    tpu.vector_store %arg3[%c0_6, %c0_7], %8 {strides = array<i32>} : memref<648x16xbf16, #tpu.memory_space<vmem>>, vector<648x16xbf16>,
    return
  }
}

module attributes {stable_mosaic.version = 11 : i64} {
  func.func @_conv_gemm_kernel(%arg0: memref<98x400xbf16, #tpu.memory_space<vmem>>, %arg1: memref<400x32xbf16, #tpu.memory_space<vmem>>, %arg2: memref<1x32xf32, #tpu.memory_space<vmem>>, %arg3: memref<98x32xbf16, #tpu.memory_space<vmem>>) attributes {dimension_semantics = [], scalar_prefetch = 0 : i64, scratch_operands = 0 : i64, tpu.core_type = #tpu.core_type<tc>} {
    %c0 = arith.constant 0 : index
    %c0_0 = arith.constant 0 : index
    %0 = vector.load %arg0[%c0, %c0_0] : memref<98x400xbf16, #tpu.memory_space<vmem>>, vector<98x400xbf16>
    %c0_1 = arith.constant 0 : index
    %c0_2 = arith.constant 0 : index
    %1 = vector.load %arg1[%c0_1, %c0_2] : memref<400x32xbf16, #tpu.memory_space<vmem>>, vector<400x32xbf16>
    %cst = arith.constant dense<0.000000e+00> : vector<98x32xf32>
    %2 = tpu.matmul %0, %1, %cst {dimension_numbers = #tpu.dot_dimension_numbers<[1], [0], [0], [1], [0, 0, 1, 1], [], []>} : vector<98x400xbf16>, vector<400x32xbf16>, vector<98x32xf32> -> vector<98x32xf32>
    %c0_3 = arith.constant 0 : index
    %c0_4 = arith.constant 0 : index
    %3 = vector.load %arg2[%c0_3, %c0_4] : memref<1x32xf32, #tpu.memory_space<vmem>>, vector<1x32xf32>
    %4 = vector.broadcast %3 : vector<1x32xf32> to vector<98x32xf32>
    %5 = arith.addf %2, %4 : vector<98x32xf32>
    %cst_5 = arith.constant 0.000000e+00 : f32
    %6 = vector.broadcast %cst_5 : f32 to vector<98x32xf32>
    %7 = arith.maximumf %5, %6 : vector<98x32xf32>
    %8 = arith.truncf %7 : vector<98x32xf32> to vector<98x32xbf16>
    %c0_6 = arith.constant 0 : index
    %c0_7 = arith.constant 0 : index
    %9 = vector.load %arg3[%c0_6, %c0_7] : memref<98x32xbf16, #tpu.memory_space<vmem>>, vector<98x32xbf16>
    tpu.vector_store %arg3[%c0_6, %c0_7], %8 {strides = array<i32>} : memref<98x32xbf16, #tpu.memory_space<vmem>>, vector<98x32xbf16>,
    return
  }
}

module attributes {stable_mosaic.version = 11 : i64} {
  func.func @_tail_kernel(%arg0: memref<4x2x800xbf16, #tpu.memory_space<vmem>>, %arg1: memref<800x32xbf16, #tpu.memory_space<vmem>>, %arg2: memref<1x32xf32, #tpu.memory_space<vmem>>, %arg3: memref<4x32x128xbf16, #tpu.memory_space<vmem>>, %arg4: memref<1x128xf32, #tpu.memory_space<vmem>>, %arg5: memref<128x6xbf16, #tpu.memory_space<vmem>>, %arg6: memref<1x6xf32, #tpu.memory_space<vmem>>, %arg7: memref<2x6xf32, #tpu.memory_space<vmem>>) attributes {dimension_semantics = [], scalar_prefetch = 0 : i64, scratch_operands = 0 : i64, tpu.core_type = #tpu.core_type<tc>} {
    %c0 = arith.constant 0 : index
    %c0_0 = arith.constant 0 : index
    %0 = vector.load %arg4[%c0, %c0_0] : memref<1x128xf32, #tpu.memory_space<vmem>>, vector<1x128xf32>
    %c0_1 = arith.constant 0 : index
    %c0_2 = arith.constant 0 : index
    %c0_3 = arith.constant 0 : index
    %1 = vector.load %arg0[%c0_1, %c0_2, %c0_3] : memref<4x2x800xbf16, #tpu.memory_space<vmem>>, vector<1x2x800xbf16>
    %2 = vector.shape_cast %1 : vector<1x2x800xbf16> to vector<2x800xbf16>
    %c0_4 = arith.constant 0 : index
    %c0_5 = arith.constant 0 : index
    %3 = vector.load %arg1[%c0_4, %c0_5] : memref<800x32xbf16, #tpu.memory_space<vmem>>, vector<800x32xbf16>
    %cst = arith.constant dense<0.000000e+00> : vector<2x32xf32>
    %4 = tpu.matmul %2, %3, %cst {dimension_numbers = #tpu.dot_dimension_numbers<[1], [0], [0], [1], [0, 0, 1, 1], [], []>} : vector<2x800xbf16>, vector<800x32xbf16>, vector<2x32xf32> -> vector<2x32xf32>
    %c0_6 = arith.constant 0 : index
    %c0_7 = arith.constant 0 : index
    %5 = vector.load %arg2[%c0_6, %c0_7] : memref<1x32xf32, #tpu.memory_space<vmem>>, vector<1x32xf32>
    %6 = vector.broadcast %5 : vector<1x32xf32> to vector<2x32xf32>
    %7 = arith.addf %4, %6 : vector<2x32xf32>
    %cst_8 = arith.constant 0.000000e+00 : f32
    %8 = vector.broadcast %cst_8 : f32 to vector<2x32xf32>
    %9 = arith.maximumf %7, %8 : vector<2x32xf32>
    %10 = arith.truncf %9 : vector<2x32xf32> to vector<2x32xbf16>
    %c0_9 = arith.constant 0 : index
    %c0_10 = arith.constant 0 : index
    %c0_11 = arith.constant 0 : index
    %11 = vector.load %arg3[%c0_9, %c0_10, %c0_11] : memref<4x32x128xbf16, #tpu.memory_space<vmem>>, vector<1x32x128xbf16>
    %12 = vector.shape_cast %11 : vector<1x32x128xbf16> to vector<32x128xbf16>
    %cst_12 = arith.constant dense<0.000000e+00> : vector<2x128xf32>
    %13 = tpu.matmul %10, %12, %cst_12 {dimension_numbers = #tpu.dot_dimension_numbers<[1], [0], [0], [1], [0, 0, 1, 1], [], []>} : vector<2x32xbf16>, vector<32x128xbf16>, vector<2x128xf32> -> vector<2x128xf32>
    %14 = vector.broadcast %0 : vector<1x128xf32> to vector<2x128xf32>
    %15 = arith.addf %14, %13 : vector<2x128xf32>
    %c1 = arith.constant 1 : index
    %c0_13 = arith.constant 0 : index
    %c0_14 = arith.constant 0 : index
    %16 = vector.load %arg0[%c1, %c0_13, %c0_14] : memref<4x2x800xbf16, #tpu.memory_space<vmem>>, vector<1x2x800xbf16>
    %17 = vector.shape_cast %16 : vector<1x2x800xbf16> to vector<2x800xbf16>
    %c0_15 = arith.constant 0 : index
    %c0_16 = arith.constant 0 : index
    %18 = vector.load %arg1[%c0_15, %c0_16] : memref<800x32xbf16, #tpu.memory_space<vmem>>, vector<800x32xbf16>
    %cst_17 = arith.constant dense<0.000000e+00> : vector<2x32xf32>
    %19 = tpu.matmul %17, %18, %cst_17 {dimension_numbers = #tpu.dot_dimension_numbers<[1], [0], [0], [1], [0, 0, 1, 1], [], []>} : vector<2x800xbf16>, vector<800x32xbf16>, vector<2x32xf32> -> vector<2x32xf32>
    %c0_18 = arith.constant 0 : index
    %c0_19 = arith.constant 0 : index
    %20 = vector.load %arg2[%c0_18, %c0_19] : memref<1x32xf32, #tpu.memory_space<vmem>>, vector<1x32xf32>
    %21 = vector.broadcast %20 : vector<1x32xf32> to vector<2x32xf32>
    %22 = arith.addf %19, %21 : vector<2x32xf32>
    %cst_20 = arith.constant 0.000000e+00 : f32
    %23 = vector.broadcast %cst_20 : f32 to vector<2x32xf32>
    %24 = arith.maximumf %22, %23 : vector<2x32xf32>
    %25 = arith.truncf %24 : vector<2x32xf32> to vector<2x32xbf16>
    %c1_21 = arith.constant 1 : index
    %c0_22 = arith.constant 0 : index
    %c0_23 = arith.constant 0 : index
    %26 = vector.load %arg3[%c1_21, %c0_22, %c0_23] : memref<4x32x128xbf16, #tpu.memory_space<vmem>>, vector<1x32x128xbf16>
    %27 = vector.shape_cast %26 : vector<1x32x128xbf16> to vector<32x128xbf16>
    %cst_24 = arith.constant dense<0.000000e+00> : vector<2x128xf32>
    %28 = tpu.matmul %25, %27, %cst_24 {dimension_numbers = #tpu.dot_dimension_numbers<[1], [0], [0], [1], [0, 0, 1, 1], [], []>} : vector<2x32xbf16>, vector<32x128xbf16>, vector<2x128xf32> -> vector<2x128xf32>
    %29 = arith.addf %15, %28 : vector<2x128xf32>
    %c2 = arith.constant 2 : index
    %c0_25 = arith.constant 0 : index
    %c0_26 = arith.constant 0 : index
    %30 = vector.load %arg0[%c2, %c0_25, %c0_26] : memref<4x2x800xbf16, #tpu.memory_space<vmem>>, vector<1x2x800xbf16>
    %31 = vector.shape_cast %30 : vector<1x2x800xbf16> to vector<2x800xbf16>
    %c0_27 = arith.constant 0 : index
    %c0_28 = arith.constant 0 : index
    %32 = vector.load %arg1[%c0_27, %c0_28] : memref<800x32xbf16, #tpu.memory_space<vmem>>, vector<800x32xbf16>
    %cst_29 = arith.constant dense<0.000000e+00> : vector<2x32xf32>
    %33 = tpu.matmul %31, %32, %cst_29 {dimension_numbers = #tpu.dot_dimension_numbers<[1], [0], [0], [1], [0, 0, 1, 1], [], []>} : vector<2x800xbf16>, vector<800x32xbf16>, vector<2x32xf32> -> vector<2x32xf32>
    %c0_30 = arith.constant 0 : index
    %c0_31 = arith.constant 0 : index
    %34 = vector.load %arg2[%c0_30, %c0_31] : memref<1x32xf32, #tpu.memory_space<vmem>>, vector<1x32xf32>
    %35 = vector.broadcast %34 : vector<1x32xf32> to vector<2x32xf32>
    %36 = arith.addf %33, %35 : vector<2x32xf32>
    %cst_32 = arith.constant 0.000000e+00 : f32
    %37 = vector.broadcast %cst_32 : f32 to vector<2x32xf32>
    %38 = arith.maximumf %36, %37 : vector<2x32xf32>
    %39 = arith.truncf %38 : vector<2x32xf32> to vector<2x32xbf16>
    %c2_33 = arith.constant 2 : index
    %c0_34 = arith.constant 0 : index
    %c0_35 = arith.constant 0 : index
    %40 = vector.load %arg3[%c2_33, %c0_34, %c0_35] : memref<4x32x128xbf16, #tpu.memory_space<vmem>>, vector<1x32x128xbf16>
    %41 = vector.shape_cast %40 : vector<1x32x128xbf16> to vector<32x128xbf16>
    %cst_36 = arith.constant dense<0.000000e+00> : vector<2x128xf32>
    %42 = tpu.matmul %39, %41, %cst_36 {dimension_numbers = #tpu.dot_dimension_numbers<[1], [0], [0], [1], [0, 0, 1, 1], [], []>} : vector<2x32xbf16>, vector<32x128xbf16>, vector<2x128xf32> -> vector<2x128xf32>
    %43 = arith.addf %29, %42 : vector<2x128xf32>
    %c3 = arith.constant 3 : index
    %c0_37 = arith.constant 0 : index
    %c0_38 = arith.constant 0 : index
    %44 = vector.load %arg0[%c3, %c0_37, %c0_38] : memref<4x2x800xbf16, #tpu.memory_space<vmem>>, vector<1x2x800xbf16>
    %45 = vector.shape_cast %44 : vector<1x2x800xbf16> to vector<2x800xbf16>
    %c0_39 = arith.constant 0 : index
    %c0_40 = arith.constant 0 : index
    %46 = vector.load %arg1[%c0_39, %c0_40] : memref<800x32xbf16, #tpu.memory_space<vmem>>, vector<800x32xbf16>
    %cst_41 = arith.constant dense<0.000000e+00> : vector<2x32xf32>
    %47 = tpu.matmul %45, %46, %cst_41 {dimension_numbers = #tpu.dot_dimension_numbers<[1], [0], [0], [1], [0, 0, 1, 1], [], []>} : vector<2x800xbf16>, vector<800x32xbf16>, vector<2x32xf32> -> vector<2x32xf32>
    %c0_42 = arith.constant 0 : index
    %c0_43 = arith.constant 0 : index
    %48 = vector.load %arg2[%c0_42, %c0_43] : memref<1x32xf32, #tpu.memory_space<vmem>>, vector<1x32xf32>
    %49 = vector.broadcast %48 : vector<1x32xf32> to vector<2x32xf32>
    %50 = arith.addf %47, %49 : vector<2x32xf32>
    %cst_44 = arith.constant 0.000000e+00 : f32
    %51 = vector.broadcast %cst_44 : f32 to vector<2x32xf32>
    %52 = arith.maximumf %50, %51 : vector<2x32xf32>
    %53 = arith.truncf %52 : vector<2x32xf32> to vector<2x32xbf16>
    %c3_45 = arith.constant 3 : index
    %c0_46 = arith.constant 0 : index
    %c0_47 = arith.constant 0 : index
    %54 = vector.load %arg3[%c3_45, %c0_46, %c0_47] : memref<4x32x128xbf16, #tpu.memory_space<vmem>>, vector<1x32x128xbf16>
    %55 = vector.shape_cast %54 : vector<1x32x128xbf16> to vector<32x128xbf16>
    %cst_48 = arith.constant dense<0.000000e+00> : vector<2x128xf32>
    %56 = tpu.matmul %53, %55, %cst_48 {dimension_numbers = #tpu.dot_dimension_numbers<[1], [0], [0], [1], [0, 0, 1, 1], [], []>} : vector<2x32xbf16>, vector<32x128xbf16>, vector<2x128xf32> -> vector<2x128xf32>
    %57 = arith.addf %43, %56 : vector<2x128xf32>
    %cst_49 = arith.constant 0.000000e+00 : f32
    %58 = vector.broadcast %cst_49 : f32 to vector<2x128xf32>
    %59 = arith.maximumf %57, %58 : vector<2x128xf32>
    %60 = arith.truncf %59 : vector<2x128xf32> to vector<2x128xbf16>
    %c0_50 = arith.constant 0 : index
    %c0_51 = arith.constant 0 : index
    %61 = vector.load %arg5[%c0_50, %c0_51] : memref<128x6xbf16, #tpu.memory_space<vmem>>, vector<128x6xbf16>
    %cst_52 = arith.constant dense<0.000000e+00> : vector<2x6xf32>
    %62 = tpu.matmul %60, %61, %cst_52 {dimension_numbers = #tpu.dot_dimension_numbers<[1], [0], [0], [1], [0, 0, 1, 1], [], []>} : vector<2x128xbf16>, vector<128x6xbf16>, vector<2x6xf32> -> vector<2x6xf32>
    %c0_53 = arith.constant 0 : index
    %c0_54 = arith.constant 0 : index
    %63 = vector.load %arg6[%c0_53, %c0_54] : memref<1x6xf32, #tpu.memory_space<vmem>>, vector<1x6xf32>
    %64 = vector.broadcast %63 : vector<1x6xf32> to vector<2x6xf32>
    %65 = arith.addf %62, %64 : vector<2x6xf32>
    %c0_55 = arith.constant 0 : index
    %c0_56 = arith.constant 0 : index
    %66 = vector.load %arg7[%c0_55, %c0_56] : memref<2x6xf32, #tpu.memory_space<vmem>>, vector<2x6xf32>
    tpu.vector_store %arg7[%c0_55, %c0_56], %65 {strides = array<i32>} : memref<2x6xf32, #tpu.memory_space<vmem>>, vector<2x6xf32>,
    return
  }
}

</mosaic_0001>

<bundles_post_ra>
// kernel: net_forward.3
= control target key start
LH: loop header
LB: loop body
LE: loop exit
PB: predicated region body
PF: predicated region fallthrough
CT: control target
= control target key end

     0   :  { %v1880_v0 = vmov 0.0   ;;  %vm1881_vm0 = vmmov 0   ;;  %vm482_vm1 = vcmask 1041408   ;;  %vm358_vm2 = vcmask 818176   ;;  %s2593_s1 = inlined_call_operand.vmem [shape: bf16[100,16], index: 1, kind: input, shape index: {}]   ;;  %s2594_s0 = inlined_call_operand.vmem [shape: bf16[648,100], index: 0, kind: input, shape index: {}]   ;;  %s2595_s2 = inlined_call_operand.vmem [shape: f32[1,16], index: 2, kind: input, shape index: {}]   ;;  %s2596_s3 = inlined_call_operand.vmem [shape: bf16[648,16], index: 3, kind: output, shape index: {}]  }
   0x1   :  { %1638 = vmatprep.subr.bf16.mxu0 %v1880_v0  ;;  %v1832_v1 = vld [vmem:[%s2593_s1] sm:$0xff]   ;;  %1816 = vmatprep.subr.bf16.mxu1 %v1880_v0  ;;  %v1833_v2 = vld [vmem:[%s2593_s1 + $0x8] sm:$0xff]   ;;  %v1834_v3 = vld [vmem:[%s2593_s1 + $0x10] sm:$0xff]   ;;  %vm1252_vm3 = vcmask 125952  }
   0x2   :  { %1652 = vmatprep.mubr.msk.bf16.mxu0 %vm1881_vm0, %v1880_v0  ;;  %1736 = vmatprep.mubr.msk.bf16.mxu1 %vm1881_vm0, %v1880_v0  ;;  %v1835_v4 = vld [vmem:[%s2593_s1 + $0x18] sm:$0xff]   ;;  %v1836_v5 = vld [vmem:[%s2593_s1 + $0x20] sm:$0xff]   ;;  %v1838_v6 = vld [vmem:[%s2593_s1 + $0x30] ss:$0 sps:$4 sm:$0x33]  }
   0x3   :  { %1639 = vmatpush3.bf16.msra.mxu0 %v1832_v1  ;;  %1823 = vmatpush3.bf16.msra.mxu1 %v1832_v1  ;;  %v1837_v7 = vld [vmem:[%s2593_s1 + $0x28] sm:$0xff]   ;;  %v484_v8 = vsel %vm482_vm1, %v1838_v6, 0  ;;  %v1839_v9 = vld [vmem:[%s2594_s0] sm:$0xff]   ;;  %v1842_v12 = vld [vmem:[%s2594_s0 + $0xb0] sm:$0xff]  }
   0x4   :  { %1640 = vmatprep.subr.bf16.mxu0 %v1880_v0  ;;  %1817 = vmatprep.subr.bf16.mxu1 %v1880_v0  ;;  %v1840_v10 = vld [vmem:[%s2594_s0 + $0xa8] sm:$0xff]   ;;  %v1843_v13 = vld [vmem:[%s2594_s0 + $0x10] sm:$0xff]   ;;  %v1844_v14 = vld [vmem:[%s2594_s0 + $0xb8] sm:$0xff]  }
   0x5   :  { %v1841_v11 = vld [vmem:[%s2594_s0 + $0x8] sm:$0xff]   ;;  %v1845_v15 = vld [vmem:[%s2594_s0 + $0x18] sm:$0xff]   ;;  %v1846_v16 = vld [vmem:[%s2594_s0 + $0xc0] sm:$0xff]  }
   0x6   :  { %v1847_v17 = vld [vmem:[%s2594_s0 + $0x20] sm:$0xff]   ;;  %v1848_v18 = vld [vmem:[%s2594_s0 + $0xc8] sm:$0xff]   ;;  %v1850_v20 = vld [vmem:[%s2594_s0 + $0xd0] sm:$0xff]  }
   0x7   :  { %1641 = vmatpush3.bf16.msra.mxu0 %v1833_v2  ;;  %1824 = vmatpush3.bf16.msra.mxu1 %v1833_v2  ;;  %v1849_v19 = vld [vmem:[%s2594_s0 + $0x28] sm:$0xff]   ;;  %v1851_v21 = vld [vmem:[%s2594_s0 + $0x30] sm:$0xff]   ;;  %v1852_v22 = vld [vmem:[%s2594_s0 + $0xd8] sm:$0xff]  }
   0x8   :  { %1642 = vmatprep.subr.bf16.mxu0 %v1880_v0  ;;  %1818 = vmatprep.subr.bf16.mxu1 %v1880_v0  ;;  %v1853_v23 = vld [vmem:[%s2594_s0 + $0x38] sm:$0xff]   ;;  %v1854_v24 = vld [vmem:[%s2594_s0 + $0xe0] sm:$0xff]   ;;  %v1856_v26 = vld [vmem:[%s2594_s0 + $0xe8] sm:$0xff]  }
   0x9   :  { %v1855_v25 = vld [vmem:[%s2594_s0 + $0x40] sm:$0xff]   ;;  %v1857_v27 = vld [vmem:[%s2594_s0 + $0x48] sm:$0xff]   ;;  %v1858_v28 = vld [vmem:[%s2594_s0 + $0xf0] sm:$0xff]  }
   0xa   :  { %v1859_v29 = vld [vmem:[%s2594_s0 + $0x50] sm:$0xff]   ;;  %v1860_v30 = vld [vmem:[%s2594_s0 + $0xf8] sm:$0xff]   ;;  %v1862_v32 = vld [vmem:[%s2594_s0 + $0x100] sm:$0xff]  }
   0xb   :  { %1643 = vmatpush3.bf16.msra.mxu0 %v1834_v3  ;;  %1825 = vmatpush3.bf16.msra.mxu1 %v1834_v3  ;;  %v1861_v31 = vld [vmem:[%s2594_s0 + $0x58] sm:$0xff]   ;;  %v1863_v33 = vld [vmem:[%s2594_s0 + $0x60] sm:$0xff]   ;;  %v1864_v34 = vld [vmem:[%s2594_s0 + $0x108] sm:$0xff]  }
   0xc   :  { %1644 = vmatprep.subr.bf16.mxu0 %v1880_v0  ;;  %1819 = vmatprep.subr.bf16.mxu1 %v1880_v0  ;;  %v1865_v35 = vld [vmem:[%s2594_s0 + $0x68] sm:$0xff]   ;;  %v1866_v36 = vld [vmem:[%s2594_s0 + $0x110] sm:$0xff]   ;;  %v1868_v38 = vld [vmem:[%s2594_s0 + $0x118] sm:$0xff]  }
   0xd   :  { %v1867_v37 = vld [vmem:[%s2594_s0 + $0x70] sm:$0xff]   ;;  %v1869_v39 = vld [vmem:[%s2594_s0 + $0x78] sm:$0xff]   ;;  %v1870_v40 = vld [vmem:[%s2594_s0 + $0x120] sm:$0xff]  }
   0xe   :  { %v1871_v41 = vld [vmem:[%s2594_s0 + $0x80] sm:$0xff]   ;;  %v1872_v42 = vld [vmem:[%s2594_s0 + $0x128] sm:$0xff]   ;;  %v1874_v44 = vld [vmem:[%s2594_s0 + $0x130] sm:$0xff]  }
   0xf   :  { %1645 = vmatpush3.bf16.msra.mxu0 %v1835_v4  ;;  %1826 = vmatpush3.bf16.msra.mxu1 %v1835_v4  ;;  %v1873_v43 = vld [vmem:[%s2594_s0 + $0x88] sm:$0xff]   ;;  %v1875_v45 = vld [vmem:[%s2594_s0 + $0x90] sm:$0xff]   ;;  %v1876_v46 = vld [vmem:[%s2594_s0 + $0x138] sm:$0xff]  }
  0x10   :  { %1646 = vmatprep.subr.bf16.mxu0 %v1880_v0  ;;  %1820 = vmatprep.subr.bf16.mxu1 %v1880_v0  ;;  %v1877_v47 = vld [vmem:[%s2594_s0 + $0x98] sm:$0xff]   ;;  %v1878_v48 = vld [vmem:[%s2594_s0 + $0x140] ss:$0 sps:$4 sm:$0xff]  }
  0x11   :  { %v1879_v49 = vld [vmem:[%s2594_s0 + $0xa0] sm:$0xff]  }
  0x12   :  { %v2186_v50 = vld [vmem:[%s2595_s2] ss:$0 sm:$0xff] }
  0x13   :  { %1647 = vmatpush3.bf16.msra.mxu0 %v1836_v5  ;;  %1827 = vmatpush3.bf16.msra.mxu1 %v1836_v5 }
  0x14   :  { %1648 = vmatprep.subr.bf16.mxu0 %v1880_v0  ;;  %1821 = vmatprep.subr.bf16.mxu1 %v1880_v0 }
  0x17   :  { %1649 = vmatpush3.bf16.msra.mxu0 %v1837_v7  ;;  %1828 = vmatpush3.bf16.msra.mxu1 %v1837_v7 }
  0x18   :  { %1650 = vmatprep.subr.bf16.mxu0 %v1880_v0  ;;  %1822 = vmatprep.subr.bf16.mxu1 %v1880_v0 }
  0x1b   :  { %1651 = vmatpush3.bf16.msra.mxu0 %v484_v8  ;;  %1829 = vmatpush3.bf16.msra.mxu1 %v484_v8 }
  0x1e   :  { %1653 = vmatmul.mubr.msk.bf16.vlgmr.msra.gmra.mrb[0].mxu0 %vm358_vm2, %v1839_v9  ;;  %1737 = vmatmul.mubr.msk.bf16.vlgmr.msra.gmra.mrb[0].mxu1 %vm358_vm2, %v1840_v10 }
  0x1f   :  { %1656 = vmatprep.mubr.msk.bf16.mxu0 %vm1881_vm0, %v1880_v0  ;;  %1740 = vmatprep.mubr.msk.bf16.mxu1 %vm1881_vm0, %v1880_v0 }
  0x26   :  { %1657 = vmatmul.mubr.msk.bf16.gmra.mrb[4].mxu0 %vm358_vm2, %v1841_v11  ;;  %1741 = vmatmul.mubr.msk.bf16.gmra.mrb[4].mxu1 %vm358_vm2, %v1842_v12 }
  0x27   :  { %1660 = vmatprep.mubr.msk.bf16.mxu0 %vm1881_vm0, %v1880_v0  ;;  %1744 = vmatprep.mubr.msk.bf16.mxu1 %vm1881_vm0, %v1880_v0 }
  0x2e   :  { %1661 = vmatmul.mubr.msk.bf16.gmra.mrb[8].mxu0 %vm358_vm2, %v1843_v13  ;;  %1745 = vmatmul.mubr.msk.bf16.gmra.mrb[8].mxu1 %vm358_vm2, %v1844_v14 }
  0x2f   :  { %1664 = vmatprep.mubr.msk.bf16.mxu0 %vm1881_vm0, %v1880_v0  ;;  %1748 = vmatprep.mubr.msk.bf16.mxu1 %vm1881_vm0, %v1880_v0 }
  0x36   :  { %1665 = vmatmul.mubr.msk.bf16.gmra.mrb[12].mxu0 %vm358_vm2, %v1845_v15  ;;  %1749 = vmatmul.mubr.msk.bf16.gmra.mrb[12].mxu1 %vm358_vm2, %v1846_v16 }
  0x37   :  { %1668 = vmatprep.mubr.msk.bf16.mxu0 %vm1881_vm0, %v1880_v0  ;;  %1752 = vmatprep.mubr.msk.bf16.mxu1 %vm1881_vm0, %v1880_v0 }
  0x3e   :  { %1669 = vmatmul.mubr.msk.bf16.gmra.mrb[16].mxu0 %vm358_vm2, %v1847_v17  ;;  %1753 = vmatmul.mubr.msk.bf16.gmra.mrb[16].mxu1 %vm358_vm2, %v1848_v18 }
  0x3f   :  { %1672 = vmatprep.mubr.msk.bf16.mxu0 %vm1881_vm0, %v1880_v0  ;;  %1756 = vmatprep.mubr.msk.bf16.mxu1 %vm1881_vm0, %v1880_v0 }
  0x46   :  { %1673 = vmatmul.mubr.msk.bf16.gmra.mrb[20].mxu0 %vm358_vm2, %v1849_v19  ;;  %1757 = vmatmul.mubr.msk.bf16.gmra.mrb[20].mxu1 %vm358_vm2, %v1850_v20 }
  0x47   :  { %1676 = vmatprep.mubr.msk.bf16.mxu0 %vm1881_vm0, %v1880_v0  ;;  %1760 = vmatprep.mubr.msk.bf16.mxu1 %vm1881_vm0, %v1880_v0 }
  0x4e   :  { %1677 = vmatmul.mubr.msk.bf16.gmra.mrb[24].mxu0 %vm358_vm2, %v1851_v21  ;;  %1761 = vmatmul.mubr.msk.bf16.gmra.mrb[24].mxu1 %vm358_vm2, %v1852_v22 }
  0x4f   :  { %1680 = vmatprep.mubr.msk.bf16.mxu0 %vm1881_vm0, %v1880_v0  ;;  %1764 = vmatprep.mubr.msk.bf16.mxu1 %vm1881_vm0, %v1880_v0 }
  0x56   :  { %1681 = vmatmul.mubr.msk.bf16.gmra.mrb[28].mxu0 %vm358_vm2, %v1853_v23  ;;  %1765 = vmatmul.mubr.msk.bf16.gmra.mrb[28].mxu1 %vm358_vm2, %v1854_v24 }
  0x57   :  { %1684 = vmatprep.mubr.msk.bf16.mxu0 %vm1881_vm0, %v1880_v0  ;;  %1768 = vmatprep.mubr.msk.bf16.mxu1 %vm1881_vm0, %v1880_v0 }
  0x5e   :  { %1685 = vmatmul.mubr.msk.bf16.gmra.mrb[32].mxu0 %vm358_vm2, %v1855_v25  ;;  %1769 = vmatmul.mubr.msk.bf16.gmra.mrb[32].mxu1 %vm358_vm2, %v1856_v26 }
  0x5f   :  { %1688 = vmatprep.mubr.msk.bf16.mxu0 %vm1881_vm0, %v1880_v0  ;;  %1772 = vmatprep.mubr.msk.bf16.mxu1 %vm1881_vm0, %v1880_v0 }
  0x66   :  { %1689 = vmatmul.mubr.msk.bf16.gmra.mrb[36].mxu0 %vm358_vm2, %v1857_v27  ;;  %1773 = vmatmul.mubr.msk.bf16.gmra.mrb[36].mxu1 %vm358_vm2, %v1858_v28 }
  0x67   :  { %1692 = vmatprep.mubr.msk.bf16.mxu0 %vm1881_vm0, %v1880_v0  ;;  %1776 = vmatprep.mubr.msk.bf16.mxu1 %vm1881_vm0, %v1880_v0 }
  0x6e   :  { %1693 = vmatmul.mubr.msk.bf16.gmra.mrb[40].mxu0 %vm358_vm2, %v1859_v29  ;;  %1777 = vmatmul.mubr.msk.bf16.gmra.mrb[40].mxu1 %vm358_vm2, %v1860_v30 }
  0x6f   :  { %1696 = vmatprep.mubr.msk.bf16.mxu0 %vm1881_vm0, %v1880_v0  ;;  %1780 = vmatprep.mubr.msk.bf16.mxu1 %vm1881_vm0, %v1880_v0 }
  0x76   :  { %1697 = vmatmul.mubr.msk.bf16.gmra.mrb[44].mxu0 %vm358_vm2, %v1861_v31  ;;  %1781 = vmatmul.mubr.msk.bf16.gmra.mrb[44].mxu1 %vm358_vm2, %v1862_v32 }
  0x77   :  { %1700 = vmatprep.mubr.msk.bf16.mxu0 %vm1881_vm0, %v1880_v0  ;;  %1784 = vmatprep.mubr.msk.bf16.mxu1 %vm1881_vm0, %v1880_v0 }
  0x7e   :  { %1701 = vmatmul.mubr.msk.bf16.gmra.mrb[48].mxu0 %vm358_vm2, %v1863_v33  ;;  %1785 = vmatmul.mubr.msk.bf16.gmra.mrb[48].mxu1 %vm358_vm2, %v1864_v34 }
  0x7f   :  { %1704 = vmatprep.mubr.msk.bf16.mxu0 %vm1881_vm0, %v1880_v0  ;;  %1788 = vmatprep.mubr.msk.bf16.mxu1 %vm1881_vm0, %v1880_v0 }
  0x86   :  { %1705 = vmatmul.mubr.msk.bf16.gmra.mrb[52].mxu0 %vm358_vm2, %v1865_v35  ;;  %1789 = vmatmul.mubr.msk.bf16.gmra.mrb[52].mxu1 %vm358_vm2, %v1866_v36 }
  0x87   :  { %1708 = vmatprep.mubr.msk.bf16.mxu0 %vm1881_vm0, %v1880_v0  ;;  %1792 = vmatprep.mubr.msk.bf16.mxu1 %vm1881_vm0, %v1880_v0 }
  0x8e   :  { %1709 = vmatmul.mubr.msk.bf16.gmra.mrb[56].mxu0 %vm358_vm2, %v1867_v37  ;;  %1793 = vmatmul.mubr.msk.bf16.gmra.mrb[56].mxu1 %vm358_vm2, %v1868_v38 }
  0x8f   :  { %1712 = vmatprep.mubr.msk.bf16.mxu0 %vm1881_vm0, %v1880_v0  ;;  %1796 = vmatprep.mubr.msk.bf16.mxu1 %vm1881_vm0, %v1880_v0 }
  0x96   :  { %1713 = vmatmul.mubr.msk.bf16.gmra.mrb[60].mxu0 %vm358_vm2, %v1869_v39  ;;  %1797 = vmatmul.mubr.msk.bf16.gmra.mrb[60].mxu1 %vm358_vm2, %v1870_v40 }
  0x97   :  { %1716 = vmatprep.mubr.msk.bf16.mxu0 %vm1881_vm0, %v1880_v0  ;;  %1800 = vmatprep.mubr.msk.bf16.mxu1 %vm1881_vm0, %v1880_v0 }
  0x9e   :  { %1717 = vmatmul.mubr.msk.bf16.gmra.mrb[64].mxu0 %vm358_vm2, %v1871_v41  ;;  %1801 = vmatmul.mubr.msk.bf16.gmra.mrb[64].mxu1 %vm358_vm2, %v1872_v42 }
  0x9f   :  { %1720 = vmatprep.mubr.msk.bf16.mxu0 %vm1881_vm0, %v1880_v0  ;;  %1804 = vmatprep.mubr.msk.bf16.mxu1 %vm1881_vm0, %v1880_v0 }
  0xa6   :  { %1721 = vmatmul.mubr.msk.bf16.gmra.mrb[68].mxu0 %vm358_vm2, %v1873_v43  ;;  %1805 = vmatmul.mubr.msk.bf16.gmra.mrb[68].mxu1 %vm358_vm2, %v1874_v44 }
  0xa7   :  { %1724 = vmatprep.mubr.msk.bf16.mxu0 %vm1881_vm0, %v1880_v0  ;;  %1808 = vmatprep.mubr.msk.bf16.mxu1 %vm1881_vm0, %v1880_v0 }
  0xae   :  { %1725 = vmatmul.mubr.msk.bf16.gmra.mrb[72].mxu0 %vm358_vm2, %v1875_v45  ;;  %1809 = vmatmul.mubr.msk.bf16.gmra.mrb[72].mxu1 %vm358_vm2, %v1876_v46 }
  0xaf   :  { %1728 = vmatprep.mubr.msk.bf16.mxu0 %vm1881_vm0, %v1880_v0  ;;  %1812 = vmatprep.mubr.msk.bf16.mxu1 %vm1881_vm0, %v1880_v0 }
  0xb6   :  { %1729 = vmatmul.mubr.msk.bf16.gmra.mrb[76].mxu0 %vm358_vm2, %v1877_v47  ;;  %1813 = vmatmul.mubr.msk.bf16.gmra.mrb[76].mxu1 %vm358_vm2, %v1878_v48 }
  0xb7   :  { %1732 = vmatprep.mubr.msk.bf16.mxu0 %vm1881_vm0, %v1880_v0 }
  0xbe   :  { %1733 = vmatmul.mubr.msk.bf16.gmra.mrb[80].mxu0 %vm358_vm2, %v1879_v49 }
  0xf1   :  { %v520_v51 = vpop.f32.mrb[0].mxu0  ;;  %v688_v52 = vpop.f32.mrb[0].mxu1 }
  0xf2   :  { %v521_v53 = vadd.f32 %v2186_v50, %v520_v51  ;;  %v1654_v54 = vpop.f32.mrb[1].mxu0  ;;  %v689_v55 = vadd.f32 %v2186_v50, %v688_v52  ;;  %v1738_v56 = vpop.f32.mrb[1].mxu1 }
  0xf3   :  { %v523_v57 = vpop.f32.mrb[2].mxu0  ;;  %v691_v58 = vpop.f32.mrb[2].mxu1 }
  0xf4   :  { %v846_v59 = vmax.f32 %v521_v53, 0.0  ;;  %v524_v60 = vadd.f32 %v2186_v50, %v523_v57  ;;  %v1655_v61 = vpop.f32.mrb[3].mxu0  ;;  %v888_v62 = vmax.f32 %v689_v55, 0.0  ;;  %v692_v63 = vadd.f32 %v2186_v50, %v691_v58  ;;  %v1739_v0 = vpop.f32.mrb[3].mxu1 }
  0xf6   :  { %v1509_v1 = vpack.c.bf16 %v846_v59, %v846_v59  ;;  %v847_v2 = vmax.f32 %v524_v60, 0.0  ;;  %v1551_v3 = vpack.c.bf16 %v888_v62, %v888_v62  ;;  %v889_v4 = vmax.f32 %v692_v63, 0.0 }
  0xf8   :  { %1253 = vst.msk [vmem:[%s2596_s3] sm:$0xf] %vm1252_vm3, %v1509_v1  ;;  %v1510_v5 = vpack.c.bf16 %v847_v2, %v847_v2  ;;  %1295 = vst.msk [vmem:[%s2596_s3 + $0xa8] sm:$0xf] %vm1252_vm3, %v1551_v3  ;;  %v1552_v6 = vpack.c.bf16 %v889_v4, %v889_v4 }
  0xf9   :  { %v528_v7 = vpop.f32.mrb[4].mxu0  ;;  %v696_v8 = vpop.f32.mrb[4].mxu1 }
  0xfa   :  { %1254 = vst.msk [vmem:[%s2596_s3 + $0x4] sm:$0xf] %vm1252_vm3, %v1510_v5  ;;  %v529_v9 = vadd.f32 %v2186_v50, %v528_v7  ;;  %v1658_v10 = vpop.f32.mrb[5].mxu0  ;;  %1296 = vst.msk [vmem:[%s2596_s3 + $0xac] sm:$0xf] %vm1252_vm3, %v1552_v6  ;;  %v697_v11 = vadd.f32 %v2186_v50, %v696_v8  ;;  %v1742_v12 = vpop.f32.mrb[5].mxu1 }
  0xfb   :  { %v531_v13 = vpop.f32.mrb[6].mxu0  ;;  %v699_v14 = vpop.f32.mrb[6].mxu1 }
  0xfc   :  { %v848_v15 = vmax.f32 %v529_v9, 0.0  ;;  %v532_v16 = vadd.f32 %v2186_v50, %v531_v13  ;;  %v1659_v17 = vpop.f32.mrb[7].mxu0  ;;  %v890_v18 = vmax.f32 %v697_v11, 0.0  ;;  %v700_v19 = vadd.f32 %v2186_v50, %v699_v14  ;;  %v1743_v20 = vpop.f32.mrb[7].mxu1 }
  0xfe   :  { %v1511_v21 = vpack.c.bf16 %v848_v15, %v848_v15  ;;  %v849_v22 = vmax.f32 %v532_v16, 0.0  ;;  %v1553_v23 = vpack.c.bf16 %v890_v18, %v890_v18  ;;  %v891_v24 = vmax.f32 %v700_v19, 0.0 }
 0x100   :  { %1255 = vst.msk [vmem:[%s2596_s3 + $0x8] sm:$0xf] %vm1252_vm3, %v1511_v21  ;;  %v1512_v25 = vpack.c.bf16 %v849_v22, %v849_v22  ;;  %1297 = vst.msk [vmem:[%s2596_s3 + $0xb0] sm:$0xf] %vm1252_vm3, %v1553_v23  ;;  %v1554_v26 = vpack.c.bf16 %v891_v24, %v891_v24 }
 0x101   :  { %v536_v27 = vpop.f32.mrb[8].mxu0  ;;  %v704_v28 = vpop.f32.mrb[8].mxu1 }
 0x102   :  { %1256 = vst.msk [vmem:[%s2596_s3 + $0xc] sm:$0xf] %vm1252_vm3, %v1512_v25  ;;  %v537_v29 = vadd.f32 %v2186_v50, %v536_v27  ;;  %v1662_v30 = vpop.f32.mrb[9].mxu0  ;;  %1298 = vst.msk [vmem:[%s2596_s3 + $0xb4] sm:$0xf] %vm1252_vm3, %v1554_v26  ;;  %v705_v31 = vadd.f32 %v2186_v50, %v704_v28  ;;  %v1746_v32 = vpop.f32.mrb[9].mxu1 }
 0x103   :  { %v539_v33 = vpop.f32.mrb[10].mxu0  ;;  %v707_v34 = vpop.f32.mrb[10].mxu1 }
 0x104   :  { %v850_v35 = vmax.f32 %v537_v29, 0.0  ;;  %v540_v36 = vadd.f32 %v2186_v50, %v539_v33  ;;  %v1663_v37 = vpop.f32.mrb[11].mxu0  ;;  %v892_v38 = vmax.f32 %v705_v31, 0.0  ;;  %v708_v39 = vadd.f32 %v2186_v50, %v707_v34  ;;  %v1747_v40 = vpop.f32.mrb[11].mxu1 }
 0x106   :  { %v1513_v41 = vpack.c.bf16 %v850_v35, %v850_v35  ;;  %v851_v42 = vmax.f32 %v540_v36, 0.0  ;;  %v1555_v43 = vpack.c.bf16 %v892_v38, %v892_v38  ;;  %v893_v44 = vmax.f32 %v708_v39, 0.0 }
 0x108   :  { %1257 = vst.msk [vmem:[%s2596_s3 + $0x10] sm:$0xf] %vm1252_vm3, %v1513_v41  ;;  %v1514_v45 = vpack.c.bf16 %v851_v42, %v851_v42  ;;  %1299 = vst.msk [vmem:[%s2596_s3 + $0xb8] sm:$0xf] %vm1252_vm3, %v1555_v43  ;;  %v1556_v46 = vpack.c.bf16 %v893_v44, %v893_v44 }
 0x109   :  { %v544_v47 = vpop.f32.mrb[12].mxu0  ;;  %v712_v48 = vpop.f32.mrb[12].mxu1 }
 0x10a   :  { %1258 = vst.msk [vmem:[%s2596_s3 + $0x14] sm:$0xf] %vm1252_vm3, %v1514_v45  ;;  %v545_v49 = vadd.f32 %v2186_v50, %v544_v47  ;;  %v1666_v51 = vpop.f32.mrb[13].mxu0  ;;  %1300 = vst.msk [vmem:[%s2596_s3 + $0xbc] sm:$0xf] %vm1252_vm3, %v1556_v46  ;;  %v713_v52 = vadd.f32 %v2186_v50, %v712_v48  ;;  %v1750_v53 = vpop.f32.mrb[13].mxu1 }
 0x10b   :  { %v547_v54 = vpop.f32.mrb[14].mxu0  ;;  %v715_v55 = vpop.f32.mrb[14].mxu1 }
 0x10c   :  { %v852_v56 = vmax.f32 %v545_v49, 0.0  ;;  %v548_v57 = vadd.f32 %v2186_v50, %v547_v54  ;;  %v1667_v58 = vpop.f32.mrb[15].mxu0  ;;  %v894_v59 = vmax.f32 %v713_v52, 0.0  ;;  %v716_v60 = vadd.f32 %v2186_v50, %v715_v55  ;;  %v1751_v61 = vpop.f32.mrb[15].mxu1 }
 0x10e   :  { %v1515_v62 = vpack.c.bf16 %v852_v56, %v852_v56  ;;  %v853_v63 = vmax.f32 %v548_v57, 0.0  ;;  %v1557_v0 = vpack.c.bf16 %v894_v59, %v894_v59  ;;  %v895_v1 = vmax.f32 %v716_v60, 0.0 }
 0x110   :  { %1259 = vst.msk [vmem:[%s2596_s3 + $0x18] sm:$0xf] %vm1252_vm3, %v1515_v62  ;;  %v1516_v2 = vpack.c.bf16 %v853_v63, %v853_v63  ;;  %1301 = vst.msk [vmem:[%s2596_s3 + $0xc0] sm:$0xf] %vm1252_vm3, %v1557_v0  ;;  %v1558_v3 = vpack.c.bf16 %v895_v1, %v895_v1 }
 0x111   :  { %v552_v4 = vpop.f32.mrb[16].mxu0  ;;  %v720_v5 = vpop.f32.mrb[16].mxu1 }
 0x112   :  { %1260 = vst.msk [vmem:[%s2596_s3 + $0x1c] sm:$0xf] %vm1252_vm3, %v1516_v2  ;;  %v553_v6 = vadd.f32 %v2186_v50, %v552_v4  ;;  %v1670_v7 = vpop.f32.mrb[17].mxu0  ;;  %1302 = vst.msk [vmem:[%s2596_s3 + $0xc4] sm:$0xf] %vm1252_vm3, %v1558_v3  ;;  %v721_v8 = vadd.f32 %v2186_v50, %v720_v5  ;;  %v1754_v9 = vpop.f32.mrb[17].mxu1 }
 0x113   :  { %v555_v10 = vpop.f32.mrb[18].mxu0  ;;  %v723_v11 = vpop.f32.mrb[18].mxu1 }
 0x114   :  { %v854_v12 = vmax.f32 %v553_v6, 0.0  ;;  %v556_v13 = vadd.f32 %v2186_v50, %v555_v10  ;;  %v1671_v14 = vpop.f32.mrb[19].mxu0  ;;  %v896_v15 = vmax.f32 %v721_v8, 0.0  ;;  %v724_v16 = vadd.f32 %v2186_v50, %v723_v11  ;;  %v1755_v17 = vpop.f32.mrb[19].mxu1 }
 0x116   :  { %v1517_v18 = vpack.c.bf16 %v854_v12, %v854_v12  ;;  %v855_v19 = vmax.f32 %v556_v13, 0.0  ;;  %v1559_v20 = vpack.c.bf16 %v896_v15, %v896_v15  ;;  %v897_v21 = vmax.f32 %v724_v16, 0.0 }
 0x118   :  { %1261 = vst.msk [vmem:[%s2596_s3 + $0x20] sm:$0xf] %vm1252_vm3, %v1517_v18  ;;  %v1518_v22 = vpack.c.bf16 %v855_v19, %v855_v19  ;;  %1303 = vst.msk [vmem:[%s2596_s3 + $0xc8] sm:$0xf] %vm1252_vm3, %v1559_v20  ;;  %v1560_v23 = vpack.c.bf16 %v897_v21, %v897_v21 }
 0x119   :  { %v560_v24 = vpop.f32.mrb[20].mxu0  ;;  %v728_v25 = vpop.f32.mrb[20].mxu1 }
 0x11a   :  { %1262 = vst.msk [vmem:[%s2596_s3 + $0x24] sm:$0xf] %vm1252_vm3, %v1518_v22  ;;  %v561_v26 = vadd.f32 %v2186_v50, %v560_v24  ;;  %v1674_v27 = vpop.f32.mrb[21].mxu0  ;;  %1304 = vst.msk [vmem:[%s2596_s3 + $0xcc] sm:$0xf] %vm1252_vm3, %v1560_v23  ;;  %v729_v28 = vadd.f32 %v2186_v50, %v728_v25  ;;  %v1758_v29 = vpop.f32.mrb[21].mxu1 }
 0x11b   :  { %v563_v30 = vpop.f32.mrb[22].mxu0  ;;  %v731_v31 = vpop.f32.mrb[22].mxu1 }
 0x11c   :  { %v856_v32 = vmax.f32 %v561_v26, 0.0  ;;  %v564_v33 = vadd.f32 %v2186_v50, %v563_v30  ;;  %v1675_v34 = vpop.f32.mrb[23].mxu0  ;;  %v898_v35 = vmax.f32 %v729_v28, 0.0  ;;  %v732_v36 = vadd.f32 %v2186_v50, %v731_v31  ;;  %v1759_v37 = vpop.f32.mrb[23].mxu1 }
 0x11e   :  { %v1519_v38 = vpack.c.bf16 %v856_v32, %v856_v32  ;;  %v857_v39 = vmax.f32 %v564_v33, 0.0  ;;  %v1561_v40 = vpack.c.bf16 %v898_v35, %v898_v35  ;;  %v899_v41 = vmax.f32 %v732_v36, 0.0 }
 0x120   :  { %1263 = vst.msk [vmem:[%s2596_s3 + $0x28] sm:$0xf] %vm1252_vm3, %v1519_v38  ;;  %v1520_v42 = vpack.c.bf16 %v857_v39, %v857_v39  ;;  %1305 = vst.msk [vmem:[%s2596_s3 + $0xd0] sm:$0xf] %vm1252_vm3, %v1561_v40  ;;  %v1562_v43 = vpack.c.bf16 %v899_v41, %v899_v41 }
 0x121   :  { %v568_v44 = vpop.f32.mrb[24].mxu0  ;;  %v736_v45 = vpop.f32.mrb[24].mxu1 }
 0x122   :  { %1264 = vst.msk [vmem:[%s2596_s3 + $0x2c] sm:$0xf] %vm1252_vm3, %v1520_v42  ;;  %v569_v46 = vadd.f32 %v2186_v50, %v568_v44  ;;  %v1678_v47 = vpop.f32.mrb[25].mxu0  ;;  %1306 = vst.msk [vmem:[%s2596_s3 + $0xd4] sm:$0xf] %vm1252_vm3, %v1562_v43  ;;  %v737_v48 = vadd.f32 %v2186_v50, %v736_v45  ;;  %v1762_v49 = vpop.f32.mrb[25].mxu1 }
 0x123   :  { %v571_v51 = vpop.f32.mrb[26].mxu0  ;;  %v739_v52 = vpop.f32.mrb[26].mxu1 }
 0x124   :  { %v858_v53 = vmax.f32 %v569_v46, 0.0  ;;  %v572_v54 = vadd.f32 %v2186_v50, %v571_v51  ;;  %v1679_v55 = vpop.f32.mrb[27].mxu0  ;;  %v900_v56 = vmax.f32 %v737_v48, 0.0  ;;  %v740_v57 = vadd.f32 %v2186_v50, %v739_v52  ;;  %v1763_v58 = vpop.f32.mrb[27].mxu1 }
 0x126   :  { %v1521_v59 = vpack.c.bf16 %v858_v53, %v858_v53  ;;  %v859_v60 = vmax.f32 %v572_v54, 0.0  ;;  %v1563_v61 = vpack.c.bf16 %v900_v56, %v900_v56  ;;  %v901_v62 = vmax.f32 %v740_v57, 0.0 }
 0x128   :  { %1265 = vst.msk [vmem:[%s2596_s3 + $0x30] sm:$0xf] %vm1252_vm3, %v1521_v59  ;;  %v1522_v63 = vpack.c.bf16 %v859_v60, %v859_v60  ;;  %1307 = vst.msk [vmem:[%s2596_s3 + $0xd8] sm:$0xf] %vm1252_vm3, %v1563_v61  ;;  %v1564_v0 = vpack.c.bf16 %v901_v62, %v901_v62 }
 0x129   :  { %v576_v1 = vpop.f32.mrb[28].mxu0  ;;  %v744_v2 = vpop.f32.mrb[28].mxu1 }
 0x12a   :  { %1266 = vst.msk [vmem:[%s2596_s3 + $0x34] sm:$0xf] %vm1252_vm3, %v1522_v63  ;;  %v577_v3 = vadd.f32 %v2186_v50, %v576_v1  ;;  %v1682_v4 = vpop.f32.mrb[29].mxu0  ;;  %1308 = vst.msk [vmem:[%s2596_s3 + $0xdc] sm:$0xf] %vm1252_vm3, %v1564_v0  ;;  %v745_v5 = vadd.f32 %v2186_v50, %v744_v2  ;;  %v1766_v6 = vpop.f32.mrb[29].mxu1 }
 0x12b   :  { %v579_v7 = vpop.f32.mrb[30].mxu0  ;;  %v747_v8 = vpop.f32.mrb[30].mxu1 }
 0x12c   :  { %v860_v9 = vmax.f32 %v577_v3, 0.0  ;;  %v580_v10 = vadd.f32 %v2186_v50, %v579_v7  ;;  %v1683_v11 = vpop.f32.mrb[31].mxu0  ;;  %v902_v12 = vmax.f32 %v745_v5, 0.0  ;;  %v748_v13 = vadd.f32 %v2186_v50, %v747_v8  ;;  %v1767_v14 = vpop.f32.mrb[31].mxu1 }
 0x12e   :  { %v1523_v15 = vpack.c.bf16 %v860_v9, %v860_v9  ;;  %v861_v16 = vmax.f32 %v580_v10, 0.0  ;;  %v1565_v17 = vpack.c.bf16 %v902_v12, %v902_v12  ;;  %v903_v18 = vmax.f32 %v748_v13, 0.0 }
 0x130   :  { %1267 = vst.msk [vmem:[%s2596_s3 + $0x38] sm:$0xf] %vm1252_vm3, %v1523_v15  ;;  %v1524_v19 = vpack.c.bf16 %v861_v16, %v861_v16  ;;  %1309 = vst.msk [vmem:[%s2596_s3 + $0xe0] sm:$0xf] %vm1252_vm3, %v1565_v17  ;;  %v1566_v20 = vpack.c.bf16 %v903_v18, %v903_v18 }
 0x131   :  { %v584_v21 = vpop.f32.mrb[32].mxu0  ;;  %v752_v22 = vpop.f32.mrb[32].mxu1 }
 0x132   :  { %1268 = vst.msk [vmem:[%s2596_s3 + $0x3c] sm:$0xf] %vm1252_vm3, %v1524_v19  ;;  %v585_v23 = vadd.f32 %v2186_v50, %v584_v21  ;;  %v1686_v24 = vpop.f32.mrb[33].mxu0  ;;  %1310 = vst.msk [vmem:[%s2596_s3 + $0xe4] sm:$0xf] %vm1252_vm3, %v1566_v20  ;;  %v753_v25 = vadd.f32 %v2186_v50, %v752_v22  ;;  %v1770_v26 = vpop.f32.mrb[33].mxu1 }
 0x133   :  { %v587_v27 = vpop.f32.mrb[34].mxu0  ;;  %v755_v28 = vpop.f32.mrb[34].mxu1 }
 0x134   :  { %v862_v29 = vmax.f32 %v585_v23, 0.0  ;;  %v588_v30 = vadd.f32 %v2186_v50, %v587_v27  ;;  %v1687_v31 = vpop.f32.mrb[35].mxu0  ;;  %v904_v32 = vmax.f32 %v753_v25, 0.0  ;;  %v756_v33 = vadd.f32 %v2186_v50, %v755_v28  ;;  %v1771_v34 = vpop.f32.mrb[35].mxu1 }
 0x136   :  { %v1525_v35 = vpack.c.bf16 %v862_v29, %v862_v29  ;;  %v863_v36 = vmax.f32 %v588_v30, 0.0  ;;  %v1567_v37 = vpack.c.bf16 %v904_v32, %v904_v32  ;;  %v905_v38 = vmax.f32 %v756_v33, 0.0 }
 0x138   :  { %1269 = vst.msk [vmem:[%s2596_s3 + $0x40] sm:$0xf] %vm1252_vm3, %v1525_v35  ;;  %v1526_v39 = vpack.c.bf16 %v863_v36, %v863_v36  ;;  %1311 = vst.msk [vmem:[%s2596_s3 + $0xe8] sm:$0xf] %vm1252_vm3, %v1567_v37  ;;  %v1568_v40 = vpack.c.bf16 %v905_v38, %v905_v38 }
 0x139   :  { %v592_v41 = vpop.f32.mrb[36].mxu0  ;;  %v760_v42 = vpop.f32.mrb[36].mxu1 }
 0x13a   :  { %1270 = vst.msk [vmem:[%s2596_s3 + $0x44] sm:$0xf] %vm1252_vm3, %v1526_v39  ;;  %v593_v43 = vadd.f32 %v2186_v50, %v592_v41  ;;  %v1690_v44 = vpop.f32.mrb[37].mxu0  ;;  %1312 = vst.msk [vmem:[%s2596_s3 + $0xec] sm:$0xf] %vm1252_vm3, %v1568_v40  ;;  %v761_v45 = vadd.f32 %v2186_v50, %v760_v42  ;;  %v1774_v46 = vpop.f32.mrb[37].mxu1 }
 0x13b   :  { %v595_v47 = vpop.f32.mrb[38].mxu0  ;;  %v763_v48 = vpop.f32.mrb[38].mxu1 }
 0x13c   :  { %v864_v49 = vmax.f32 %v593_v43, 0.0  ;;  %v596_v51 = vadd.f32 %v2186_v50, %v595_v47  ;;  %v1691_v52 = vpop.f32.mrb[39].mxu0  ;;  %v906_v53 = vmax.f32 %v761_v45, 0.0  ;;  %v764_v54 = vadd.f32 %v2186_v50, %v763_v48  ;;  %v1775_v55 = vpop.f32.mrb[39].mxu1 }
 0x13e   :  { %v1527_v56 = vpack.c.bf16 %v864_v49, %v864_v49  ;;  %v865_v57 = vmax.f32 %v596_v51, 0.0  ;;  %v1569_v58 = vpack.c.bf16 %v906_v53, %v906_v53  ;;  %v907_v59 = vmax.f32 %v764_v54, 0.0 }
 0x140   :  { %1271 = vst.msk [vmem:[%s2596_s3 + $0x48] sm:$0xf] %vm1252_vm3, %v1527_v56  ;;  %v1528_v60 = vpack.c.bf16 %v865_v57, %v865_v57  ;;  %1313 = vst.msk [vmem:[%s2596_s3 + $0xf0] sm:$0xf] %vm1252_vm3, %v1569_v58  ;;  %v1570_v61 = vpack.c.bf16 %v907_v59, %v907_v59 }
 0x141   :  { %v600_v62 = vpop.f32.mrb[40].mxu0  ;;  %v768_v63 = vpop.f32.mrb[40].mxu1 }
 0x142   :  { %1272 = vst.msk [vmem:[%s2596_s3 + $0x4c] sm:$0xf] %vm1252_vm3, %v1528_v60  ;;  %v601_v0 = vadd.f32 %v2186_v50, %v600_v62  ;;  %v1694_v1 = vpop.f32.mrb[41].mxu0  ;;  %1314 = vst.msk [vmem:[%s2596_s3 + $0xf4] sm:$0xf] %vm1252_vm3, %v1570_v61  ;;  %v769_v2 = vadd.f32 %v2186_v50, %v768_v63  ;;  %v1778_v3 = vpop.f32.mrb[41].mxu1 }
 0x143   :  { %v603_v4 = vpop.f32.mrb[42].mxu0  ;;  %v771_v5 = vpop.f32.mrb[42].mxu1 }
 0x144   :  { %v866_v6 = vmax.f32 %v601_v0, 0.0  ;;  %v604_v7 = vadd.f32 %v2186_v50, %v603_v4  ;;  %v1695_v8 = vpop.f32.mrb[43].mxu0  ;;  %v908_v9 = vmax.f32 %v769_v2, 0.0  ;;  %v772_v10 = vadd.f32 %v2186_v50, %v771_v5  ;;  %v1779_v11 = vpop.f32.mrb[43].mxu1 }
 0x146   :  { %v1529_v12 = vpack.c.bf16 %v866_v6, %v866_v6  ;;  %v867_v13 = vmax.f32 %v604_v7, 0.0  ;;  %v1571_v14 = vpack.c.bf16 %v908_v9, %v908_v9  ;;  %v909_v15 = vmax.f32 %v772_v10, 0.0 }
 0x148   :  { %1273 = vst.msk [vmem:[%s2596_s3 + $0x50] sm:$0xf] %vm1252_vm3, %v1529_v12  ;;  %v1530_v16 = vpack.c.bf16 %v867_v13, %v867_v13  ;;  %1315 = vst.msk [vmem:[%s2596_s3 + $0xf8] sm:$0xf] %vm1252_vm3, %v1571_v14  ;;  %v1572_v17 = vpack.c.bf16 %v909_v15, %v909_v15 }
 0x149   :  { %v608_v18 = vpop.f32.mrb[44].mxu0  ;;  %v776_v19 = vpop.f32.mrb[44].mxu1 }
 0x14a   :  { %1274 = vst.msk [vmem:[%s2596_s3 + $0x54] sm:$0xf] %vm1252_vm3, %v1530_v16  ;;  %v609_v20 = vadd.f32 %v2186_v50, %v608_v18  ;;  %v1698_v21 = vpop.f32.mrb[45].mxu0  ;;  %1316 = vst.msk [vmem:[%s2596_s3 + $0xfc] sm:$0xf] %vm1252_vm3, %v1572_v17  ;;  %v777_v22 = vadd.f32 %v2186_v50, %v776_v19  ;;  %v1782_v23 = vpop.f32.mrb[45].mxu1 }
 0x14b   :  { %v611_v24 = vpop.f32.mrb[46].mxu0  ;;  %v779_v25 = vpop.f32.mrb[46].mxu1 }
 0x14c   :  { %v868_v26 = vmax.f32 %v609_v20, 0.0  ;;  %v612_v27 = vadd.f32 %v2186_v50, %v611_v24  ;;  %v1699_v28 = vpop.f32.mrb[47].mxu0  ;;  %v910_v29 = vmax.f32 %v777_v22, 0.0  ;;  %v780_v30 = vadd.f32 %v2186_v50, %v779_v25  ;;  %v1783_v31 = vpop.f32.mrb[47].mxu1 }
 0x14e   :  { %v1531_v32 = vpack.c.bf16 %v868_v26, %v868_v26  ;;  %v869_v33 = vmax.f32 %v612_v27, 0.0  ;;  %v1573_v34 = vpack.c.bf16 %v910_v29, %v910_v29  ;;  %v911_v35 = vmax.f32 %v780_v30, 0.0 }
 0x150   :  { %1275 = vst.msk [vmem:[%s2596_s3 + $0x58] sm:$0xf] %vm1252_vm3, %v1531_v32  ;;  %v1532_v36 = vpack.c.bf16 %v869_v33, %v869_v33  ;;  %1317 = vst.msk [vmem:[%s2596_s3 + $0x100] sm:$0xf] %vm1252_vm3, %v1573_v34  ;;  %v1574_v37 = vpack.c.bf16 %v911_v35, %v911_v35 }
 0x151   :  { %v616_v38 = vpop.f32.mrb[48].mxu0  ;;  %v784_v39 = vpop.f32.mrb[48].mxu1 }
 0x152   :  { %1276 = vst.msk [vmem:[%s2596_s3 + $0x5c] sm:$0xf] %vm1252_vm3, %v1532_v36  ;;  %v617_v40 = vadd.f32 %v2186_v50, %v616_v38  ;;  %v1702_v41 = vpop.f32.mrb[49].mxu0  ;;  %1318 = vst.msk [vmem:[%s2596_s3 + $0x104] sm:$0xf] %vm1252_vm3, %v1574_v37  ;;  %v785_v42 = vadd.f32 %v2186_v50, %v784_v39  ;;  %v1786_v43 = vpop.f32.mrb[49].mxu1 }
 0x153   :  { %v619_v44 = vpop.f32.mrb[50].mxu0  ;;  %v787_v45 = vpop.f32.mrb[50].mxu1 }
 0x154   :  { %v870_v46 = vmax.f32 %v617_v40, 0.0  ;;  %v620_v47 = vadd.f32 %v2186_v50, %v619_v44  ;;  %v1703_v48 = vpop.f32.mrb[51].mxu0  ;;  %v912_v49 = vmax.f32 %v785_v42, 0.0  ;;  %v788_v51 = vadd.f32 %v2186_v50, %v787_v45  ;;  %v1787_v52 = vpop.f32.mrb[51].mxu1 }
 0x156   :  { %v1533_v53 = vpack.c.bf16 %v870_v46, %v870_v46  ;;  %v871_v54 = vmax.f32 %v620_v47, 0.0  ;;  %v1575_v55 = vpack.c.bf16 %v912_v49, %v912_v49  ;;  %v913_v56 = vmax.f32 %v788_v51, 0.0 }
 0x158   :  { %1277 = vst.msk [vmem:[%s2596_s3 + $0x60] sm:$0xf] %vm1252_vm3, %v1533_v53  ;;  %v1534_v57 = vpack.c.bf16 %v871_v54, %v871_v54  ;;  %1319 = vst.msk [vmem:[%s2596_s3 + $0x108] sm:$0xf] %vm1252_vm3, %v1575_v55  ;;  %v1576_v58 = vpack.c.bf16 %v913_v56, %v913_v56 }
 0x159   :  { %v624_v59 = vpop.f32.mrb[52].mxu0  ;;  %v792_v60 = vpop.f32.mrb[52].mxu1 }
 0x15a   :  { %1278 = vst.msk [vmem:[%s2596_s3 + $0x64] sm:$0xf] %vm1252_vm3, %v1534_v57  ;;  %v625_v61 = vadd.f32 %v2186_v50, %v624_v59  ;;  %v1706_v62 = vpop.f32.mrb[53].mxu0  ;;  %1320 = vst.msk [vmem:[%s2596_s3 + $0x10c] sm:$0xf] %vm1252_vm3, %v1576_v58  ;;  %v793_v63 = vadd.f32 %v2186_v50, %v792_v60  ;;  %v1790_v0 = vpop.f32.mrb[53].mxu1 }
 0x15b   :  { %v627_v1 = vpop.f32.mrb[54].mxu0  ;;  %v795_v2 = vpop.f32.mrb[54].mxu1 }
 0x15c   :  { %v872_v3 = vmax.f32 %v625_v61, 0.0  ;;  %v628_v4 = vadd.f32 %v2186_v50, %v627_v1  ;;  %v1707_v5 = vpop.f32.mrb[55].mxu0  ;;  %v914_v6 = vmax.f32 %v793_v63, 0.0  ;;  %v796_v7 = vadd.f32 %v2186_v50, %v795_v2  ;;  %v1791_v8 = vpop.f32.mrb[55].mxu1 }
 0x15e   :  { %v1535_v9 = vpack.c.bf16 %v872_v3, %v872_v3  ;;  %v873_v10 = vmax.f32 %v628_v4, 0.0  ;;  %v1577_v11 = vpack.c.bf16 %v914_v6, %v914_v6  ;;  %v915_v12 = vmax.f32 %v796_v7, 0.0 }
 0x160   :  { %1279 = vst.msk [vmem:[%s2596_s3 + $0x68] sm:$0xf] %vm1252_vm3, %v1535_v9  ;;  %v1536_v13 = vpack.c.bf16 %v873_v10, %v873_v10  ;;  %1321 = vst.msk [vmem:[%s2596_s3 + $0x110] sm:$0xf] %vm1252_vm3, %v1577_v11  ;;  %v1578_v14 = vpack.c.bf16 %v915_v12, %v915_v12 }
 0x161   :  { %v632_v15 = vpop.f32.mrb[56].mxu0  ;;  %v800_v16 = vpop.f32.mrb[56].mxu1 }
 0x162   :  { %1280 = vst.msk [vmem:[%s2596_s3 + $0x6c] sm:$0xf] %vm1252_vm3, %v1536_v13  ;;  %v633_v17 = vadd.f32 %v2186_v50, %v632_v15  ;;  %v1710_v18 = vpop.f32.mrb[57].mxu0  ;;  %1322 = vst.msk [vmem:[%s2596_s3 + $0x114] sm:$0xf] %vm1252_vm3, %v1578_v14  ;;  %v801_v19 = vadd.f32 %v2186_v50, %v800_v16  ;;  %v1794_v20 = vpop.f32.mrb[57].mxu1 }
 0x163   :  { %v635_v21 = vpop.f32.mrb[58].mxu0  ;;  %v803_v22 = vpop.f32.mrb[58].mxu1 }
 0x164   :  { %v874_v23 = vmax.f32 %v633_v17, 0.0  ;;  %v636_v24 = vadd.f32 %v2186_v50, %v635_v21  ;;  %v1711_v25 = vpop.f32.mrb[59].mxu0  ;;  %v916_v26 = vmax.f32 %v801_v19, 0.0  ;;  %v804_v27 = vadd.f32 %v2186_v50, %v803_v22  ;;  %v1795_v28 = vpop.f32.mrb[59].mxu1 }
 0x166   :  { %v1537_v29 = vpack.c.bf16 %v874_v23, %v874_v23  ;;  %v875_v30 = vmax.f32 %v636_v24, 0.0  ;;  %v1579_v31 = vpack.c.bf16 %v916_v26, %v916_v26  ;;  %v917_v32 = vmax.f32 %v804_v27, 0.0 }
 0x168   :  { %1281 = vst.msk [vmem:[%s2596_s3 + $0x70] sm:$0xf] %vm1252_vm3, %v1537_v29  ;;  %v1538_v33 = vpack.c.bf16 %v875_v30, %v875_v30  ;;  %1323 = vst.msk [vmem:[%s2596_s3 + $0x118] sm:$0xf] %vm1252_vm3, %v1579_v31  ;;  %v1580_v34 = vpack.c.bf16 %v917_v32, %v917_v32 }
 0x169   :  { %v640_v35 = vpop.f32.mrb[60].mxu0  ;;  %v808_v36 = vpop.f32.mrb[60].mxu1 }
 0x16a   :  { %1282 = vst.msk [vmem:[%s2596_s3 + $0x74] sm:$0xf] %vm1252_vm3, %v1538_v33  ;;  %v641_v37 = vadd.f32 %v2186_v50, %v640_v35  ;;  %v1714_v38 = vpop.f32.mrb[61].mxu0  ;;  %1324 = vst.msk [vmem:[%s2596_s3 + $0x11c] sm:$0xf] %vm1252_vm3, %v1580_v34  ;;  %v809_v39 = vadd.f32 %v2186_v50, %v808_v36  ;;  %v1798_v40 = vpop.f32.mrb[61].mxu1 }
 0x16b   :  { %v643_v41 = vpop.f32.mrb[62].mxu0  ;;  %v811_v42 = vpop.f32.mrb[62].mxu1 }
 0x16c   :  { %v876_v43 = vmax.f32 %v641_v37, 0.0  ;;  %v644_v44 = vadd.f32 %v2186_v50, %v643_v41  ;;  %v1715_v45 = vpop.f32.mrb[63].mxu0  ;;  %v918_v46 = vmax.f32 %v809_v39, 0.0  ;;  %v812_v47 = vadd.f32 %v2186_v50, %v811_v42  ;;  %v1799_v48 = vpop.f32.mrb[63].mxu1 }
 0x16e   :  { %v1539_v49 = vpack.c.bf16 %v876_v43, %v876_v43  ;;  %v877_v51 = vmax.f32 %v644_v44, 0.0  ;;  %v1581_v52 = vpack.c.bf16 %v918_v46, %v918_v46  ;;  %v919_v53 = vmax.f32 %v812_v47, 0.0 }
 0x170   :  { %1283 = vst.msk [vmem:[%s2596_s3 + $0x78] sm:$0xf] %vm1252_vm3, %v1539_v49  ;;  %v1540_v54 = vpack.c.bf16 %v877_v51, %v877_v51  ;;  %1325 = vst.msk [vmem:[%s2596_s3 + $0x120] sm:$0xf] %vm1252_vm3, %v1581_v52  ;;  %v1582_v55 = vpack.c.bf16 %v919_v53, %v919_v53 }
 0x171   :  { %v648_v56 = vpop.f32.mrb[64].mxu0  ;;  %v816_v57 = vpop.f32.mrb[64].mxu1 }
 0x172   :  { %1284 = vst.msk [vmem:[%s2596_s3 + $0x7c] sm:$0xf] %vm1252_vm3, %v1540_v54  ;;  %v649_v58 = vadd.f32 %v2186_v50, %v648_v56  ;;  %v1718_v59 = vpop.f32.mrb[65].mxu0  ;;  %1326 = vst.msk [vmem:[%s2596_s3 + $0x124] sm:$0xf] %vm1252_vm3, %v1582_v55  ;;  %v817_v60 = vadd.f32 %v2186_v50, %v816_v57  ;;  %v1802_v61 = vpop.f32.mrb[65].mxu1 }
 0x173   :  { %v651_v62 = vpop.f32.mrb[66].mxu0  ;;  %v819_v63 = vpop.f32.mrb[66].mxu1 }
 0x174   :  { %v878_v0 = vmax.f32 %v649_v58, 0.0  ;;  %v652_v1 = vadd.f32 %v2186_v50, %v651_v62  ;;  %v1719_v2 = vpop.f32.mrb[67].mxu0  ;;  %v920_v3 = vmax.f32 %v817_v60, 0.0  ;;  %v820_v4 = vadd.f32 %v2186_v50, %v819_v63  ;;  %v1803_v5 = vpop.f32.mrb[67].mxu1 }
 0x176   :  { %v1541_v6 = vpack.c.bf16 %v878_v0, %v878_v0  ;;  %v879_v7 = vmax.f32 %v652_v1, 0.0  ;;  %v1583_v8 = vpack.c.bf16 %v920_v3, %v920_v3  ;;  %v921_v9 = vmax.f32 %v820_v4, 0.0 }
 0x178   :  { %1285 = vst.msk [vmem:[%s2596_s3 + $0x80] sm:$0xf] %vm1252_vm3, %v1541_v6  ;;  %v1542_v10 = vpack.c.bf16 %v879_v7, %v879_v7  ;;  %1327 = vst.msk [vmem:[%s2596_s3 + $0x128] sm:$0xf] %vm1252_vm3, %v1583_v8  ;;  %v1584_v11 = vpack.c.bf16 %v921_v9, %v921_v9 }
 0x179   :  { %v656_v12 = vpop.f32.mrb[68].mxu0  ;;  %v824_v13 = vpop.f32.mrb[68].mxu1 }
 0x17a   :  { %1286 = vst.msk [vmem:[%s2596_s3 + $0x84] sm:$0xf] %vm1252_vm3, %v1542_v10  ;;  %v657_v14 = vadd.f32 %v2186_v50, %v656_v12  ;;  %v1722_v15 = vpop.f32.mrb[69].mxu0  ;;  %1328 = vst.msk [vmem:[%s2596_s3 + $0x12c] sm:$0xf] %vm1252_vm3, %v1584_v11  ;;  %v825_v16 = vadd.f32 %v2186_v50, %v824_v13  ;;  %v1806_v17 = vpop.f32.mrb[69].mxu1 }
 0x17b   :  { %v659_v18 = vpop.f32.mrb[70].mxu0  ;;  %v827_v19 = vpop.f32.mrb[70].mxu1 }
 0x17c   :  { %v880_v20 = vmax.f32 %v657_v14, 0.0  ;;  %v660_v21 = vadd.f32 %v2186_v50, %v659_v18  ;;  %v1723_v22 = vpop.f32.mrb[71].mxu0  ;;  %v922_v23 = vmax.f32 %v825_v16, 0.0  ;;  %v828_v24 = vadd.f32 %v2186_v50, %v827_v19  ;;  %v1807_v25 = vpop.f32.mrb[71].mxu1 }
 0x17e   :  { %v1543_v26 = vpack.c.bf16 %v880_v20, %v880_v20  ;;  %v881_v27 = vmax.f32 %v660_v21, 0.0  ;;  %v1585_v28 = vpack.c.bf16 %v922_v23, %v922_v23  ;;  %v923_v29 = vmax.f32 %v828_v24, 0.0 }
 0x180   :  { %1287 = vst.msk [vmem:[%s2596_s3 + $0x88] sm:$0xf] %vm1252_vm3, %v1543_v26  ;;  %v1544_v30 = vpack.c.bf16 %v881_v27, %v881_v27  ;;  %1329 = vst.msk [vmem:[%s2596_s3 + $0x130] sm:$0xf] %vm1252_vm3, %v1585_v28  ;;  %v1586_v31 = vpack.c.bf16 %v923_v29, %v923_v29 }
 0x181   :  { %v664_v32 = vpop.f32.mrb[72].mxu0  ;;  %v832_v33 = vpop.f32.mrb[72].mxu1 }
 0x182   :  { %1288 = vst.msk [vmem:[%s2596_s3 + $0x8c] sm:$0xf] %vm1252_vm3, %v1544_v30  ;;  %v665_v34 = vadd.f32 %v2186_v50, %v664_v32  ;;  %v1726_v35 = vpop.f32.mrb[73].mxu0  ;;  %1330 = vst.msk [vmem:[%s2596_s3 + $0x134] sm:$0xf] %vm1252_vm3, %v1586_v31  ;;  %v833_v36 = vadd.f32 %v2186_v50, %v832_v33  ;;  %v1810_v37 = vpop.f32.mrb[73].mxu1 }
 0x183   :  { %v667_v38 = vpop.f32.mrb[74].mxu0  ;;  %v835_v39 = vpop.f32.mrb[74].mxu1 }
 0x184   :  { %v882_v40 = vmax.f32 %v665_v34, 0.0  ;;  %v668_v41 = vadd.f32 %v2186_v50, %v667_v38  ;;  %v1727_v42 = vpop.f32.mrb[75].mxu0  ;;  %v924_v43 = vmax.f32 %v833_v36, 0.0  ;;  %v836_v44 = vadd.f32 %v2186_v50, %v835_v39  ;;  %v1811_v45 = vpop.f32.mrb[75].mxu1 }
 0x186   :  { %v1545_v46 = vpack.c.bf16 %v882_v40, %v882_v40  ;;  %v883_v47 = vmax.f32 %v668_v41, 0.0  ;;  %v1587_v48 = vpack.c.bf16 %v924_v43, %v924_v43  ;;  %v925_v49 = vmax.f32 %v836_v44, 0.0 }
 0x188   :  { %1289 = vst.msk [vmem:[%s2596_s3 + $0x90] sm:$0xf] %vm1252_vm3, %v1545_v46  ;;  %v1546_v51 = vpack.c.bf16 %v883_v47, %v883_v47  ;;  %1331 = vst.msk [vmem:[%s2596_s3 + $0x138] sm:$0xf] %vm1252_vm3, %v1587_v48  ;;  %v1588_v52 = vpack.c.bf16 %v925_v49, %v925_v49 }
 0x189   :  { %v672_v53 = vpop.f32.mrb[76].mxu0  ;;  %v840_v54 = vpop.f32.mrb[76].mxu1 }
 0x18a   :  { %1290 = vst.msk [vmem:[%s2596_s3 + $0x94] sm:$0xf] %vm1252_vm3, %v1546_v51  ;;  %v673_v55 = vadd.f32 %v2186_v50, %v672_v53  ;;  %v1730_v56 = vpop.f32.mrb[77].mxu0  ;;  %1332 = vst.msk [vmem:[%s2596_s3 + $0x13c] sm:$0xf] %vm1252_vm3, %v1588_v52  ;;  %v841_v57 = vadd.f32 %v2186_v50, %v840_v54  ;;  %v1814_v58 = vpop.f32.mrb[77].mxu1 }
 0x18b   :  { %v675_v59 = vpop.f32.mrb[78].mxu0  ;;  %v843_v60 = vpop.f32.mrb[78].mxu1 }
 0x18c   :  { %v884_v61 = vmax.f32 %v673_v55, 0.0  ;;  %v676_v62 = vadd.f32 %v2186_v50, %v675_v59  ;;  %v1731_v63 = vpop.f32.mrb[79].mxu0  ;;  %v926_v0 = vmax.f32 %v841_v57, 0.0  ;;  %v1815_v1 = vpop.f32.mrb[79].mxu1 }
 0x18e   :  { %v1547_v2 = vpack.c.bf16 %v884_v61, %v884_v61  ;;  %v885_v3 = vmax.f32 %v676_v62, 0.0  ;;  %v1589_v4 = vpack.c.bf16 %v926_v0, %v926_v0 }
 0x190   :  { %1291 = vst.msk [vmem:[%s2596_s3 + $0x98] sm:$0xf] %vm1252_vm3, %v1547_v2  ;;  %v1548_v5 = vpack.c.bf16 %v885_v3, %v885_v3  ;;  %1333 = vst.msk [vmem:[%s2596_s3 + $0x140] sm:$0xf] %vm1252_vm3, %v1589_v4 }
 0x191   :  { %v680_v6 = vpop.f32.mrb[80].mxu0 }
 0x192   :  { %1292 = vst.msk [vmem:[%s2596_s3 + $0x9c] sm:$0xf] %vm1252_vm3, %v1548_v5  ;;  %v681_v7 = vadd.f32 %v2186_v50, %v680_v6  ;;  %v1734_v8 = vpop.f32.mrb[81].mxu0 }
 0x193   :  { %v683_v9 = vpop.f32.mrb[82].mxu0 }
 0x194   :  { %v886_v10 = vmax.f32 %v681_v7, 0.0  ;;  %v684_v11 = vadd.f32 %v2186_v50, %v683_v9  ;;  %v1735_v12 = vpop.f32.mrb[83].mxu0 }
 0x196   :  { %v1549_v13 = vpack.c.bf16 %v886_v10, %v886_v10  ;;  %v887_v14 = vmax.f32 %v684_v11, 0.0 }
 0x198   :  { %1293 = vst.msk [vmem:[%s2596_s3 + $0xa0] sm:$0xf] %vm1252_vm3, %v1549_v13  ;;  %v1550_v15 = vpack.c.bf16 %v887_v14, %v887_v14 }
 0x19a   :  { %1294 = vst.msk [vmem:[%s2596_s3 + $0xa4] sm:$0xf] %vm1252_vm3, %v1550_v15 }

// kernel: net_forward.4
= control target key start
LH: loop header
LB: loop body
LE: loop exit
PB: predicated region body
PF: predicated region fallthrough
CT: control target
= control target key end

     0   :  { %v869_v0 = vmov 0   ;;  %vm375_vm0 = vcmask 130048   ;;  %vm639_vm1 = vcmask 257024   ;;  %vm652_vm2 = vcmask 253952   ;;  %s1128_s1 = inlined_call_operand.vmem [shape: bf16[400,32], index: 1, kind: input, shape index: {}]   ;;  %s1129_s0 = inlined_call_operand.vmem [shape: bf16[98,400], index: 0, kind: input, shape index: {}]   ;;  %s1130_s2 = inlined_call_operand.vmem [shape: f32[1,32], index: 2, kind: input, shape index: {}]   ;;  %s1131_s3 = inlined_call_operand.vmem [shape: bf16[98,32], index: 3, kind: output, shape index: {}]  }
   0x1   :  { %485 = vmatprep.subr.bf16.mxu1 %v869_v0  ;;  %v804_v1 = vld [vmem:[%s1128_s1 + $0x40] sm:$0xff]   ;;  %v807_v4 = vld [vmem:[%s1128_s1 + $0x48] sm:$0xff]   ;;  %v810_v7 = vld [vmem:[%s1128_s1 + $0x50] sm:$0xff]  }
   0x2   :  { %v805_v2 = vld [vmem:[%s1128_s1 + $0x80] sm:$0xff]   ;;  %745 = vmatprep.subr.bf16.mxu0 %v804_v1  ;;  %v808_v5 = vld [vmem:[%s1128_s1 + $0x88] sm:$0xff]   ;;  %v811_v8 = vld [vmem:[%s1128_s1 + $0x90] sm:$0xff]  }
   0x3   :  { %v806_v3 = vld [vmem:[%s1128_s1] sm:$0xff]   ;;  %486 = vmatpush1.bf16.msra.mxu1 %v805_v2  ;;  %v809_v6 = vld [vmem:[%s1128_s1 + $0x8] sm:$0xff]   ;;  %v812_v9 = vld [vmem:[%s1128_s1 + $0x10] sm:$0xff]  }
   0x4   :  { %746 = vmatpush3.bf16.msra.mxu0 %v806_v3  ;;  %487 = vmatprep.subr.bf16.mxu1 %v869_v0  ;;  %v813_v10 = vld [vmem:[%s1128_s1 + $0x58] sm:$0xff]   ;;  %v816_v13 = vld [vmem:[%s1128_s1 + $0x60] sm:$0xff]   ;;  %v819_v16 = vld [vmem:[%s1128_s1 + $0x68] sm:$0xff]  }
   0x5   :  { %747 = vmatprep.subr.bf16.mxu0 %v807_v4  ;;  %v814_v11 = vld [vmem:[%s1128_s1 + $0x98] sm:$0xff]   ;;  %v817_v14 = vld [vmem:[%s1128_s1 + $0xa0] sm:$0xff]   ;;  %v820_v17 = vld [vmem:[%s1128_s1 + $0xa8] sm:$0xff]  }
   0x6   :  { %v815_v12 = vld [vmem:[%s1128_s1 + $0x18] sm:$0xff]   ;;  %v818_v15 = vld [vmem:[%s1128_s1 + $0x20] sm:$0xff]   ;;  %v821_v18 = vld [vmem:[%s1128_s1 + $0x28] sm:$0xff]  }
   0x7   :  { %488 = vmatpush1.bf16.msra.mxu1 %v808_v5  ;;  %v822_v19 = vld [vmem:[%s1128_s1 + $0x70] sm:$0xff]   ;;  %v825_v22 = vld [vmem:[%s1128_s1 + $0x78] sm:$0xff]   ;;  %v831_v28 = vld [vmem:[%s1128_s1 + $0xc0] sm:$0xff]  }
   0x8   :  { %748 = vmatpush3.bf16.msra.mxu0 %v809_v6  ;;  %489 = vmatprep.subr.bf16.mxu1 %v869_v0  ;;  %v823_v20 = vld [vmem:[%s1128_s1 + $0xb0] sm:$0xff]   ;;  %v826_v24 = vld [vmem:[%s1128_s1 + $0xb8] sm:$0xff]   ;;  %v39_v48 = vld [vmem:[%s1129_s0 + $0xc0] sm:$0x11] }
   0x9   :  { %749 = vmatprep.subr.bf16.mxu0 %v810_v7  ;;  %v824_v21 = vld [vmem:[%s1128_s1 + $0x30] sm:$0xff]   ;;  %v834_v25 = vld [vmem:[%s1129_s0 + $0xc] ss:$16 sps:$4 sm:$0xff]   ;;  %v832_v30 = vld [vmem:[%s1129_s0 + $0x8] ss:$16 sps:$4 sm:$0xff]   ;;  %v684_v50 = vcombine.high %v39_v48, %v39_v48  ;;  %v683_v54 = vcombine.low %v39_v48, %v39_v48 }
   0xa   :  { %v830_v23 = vld [vmem:[%s1129_s0 + $0x4] ss:$16 sps:$4 sm:$0xff]   ;;  %v827_v26 = vld [vmem:[%s1128_s1 + $0x38] sm:$0xff]   ;;  %712 = vmatprep.mubr.msk.bf16.mxu1 %vm375_vm0, %v834_v25  ;;  %v828_v27 = vld [vmem:[%s1129_s0] ss:$16 sps:$4 sm:$0xff]  }
   0xb   :  { %490 = vmatpush1.bf16.msra.mxu1 %v811_v8  ;;  %429 = vmatprep.mubr.bf16.mxu0 %v830_v23  ;;  %v835_v29 = vld [vmem:[%s1129_s0 + $0x24] ss:$16 sps:$4 sm:$0xff]   ;;  %v838_v31 = vld [vmem:[%s1129_s0 + $0x2c] ss:$16 sps:$4 sm:$0xff]   ;;  %v837_v32 = vld [vmem:[%s1129_s0 + $0x20] ss:$16 sps:$4 sm:$0xff]  }
   0xc   :  { %750 = vmatpush3.bf16.msra.mxu0 %v812_v9  ;;  %491 = vmatprep.subr.bf16.mxu1 %v869_v0  ;;  %v841_v33 = vld [vmem:[%s1129_s0 + $0x44] ss:$16 sps:$4 sm:$0xff]   ;;  %v840_v34 = vld [vmem:[%s1129_s0 + $0x28] ss:$16 sps:$4 sm:$0xff]   ;;  %v844_v35 = vld [vmem:[%s1129_s0 + $0x4c] ss:$16 sps:$4 sm:$0xff]  }
   0xd   :  { %751 = vmatprep.subr.bf16.mxu0 %v813_v10  ;;  %v843_v36 = vld [vmem:[%s1129_s0 + $0x40] ss:$16 sps:$4 sm:$0xff]   ;;  %v847_v37 = vld [vmem:[%s1129_s0 + $0x64] ss:$16 sps:$4 sm:$0xff]   ;;  %v846_v38 = vld [vmem:[%s1129_s0 + $0x48] ss:$16 sps:$4 sm:$0xff]  }
   0xe   :  { %v850_v39 = vld [vmem:[%s1129_s0 + $0x6c] ss:$16 sps:$4 sm:$0xff]   ;;  %v849_v40 = vld [vmem:[%s1129_s0 + $0x60] ss:$16 sps:$4 sm:$0xff]   ;;  %v853_v41 = vld [vmem:[%s1129_s0 + $0x84] ss:$16 sps:$4 sm:$0xff]  }
   0xf   :  { %492 = vmatpush1.bf16.msra.mxu1 %v814_v11  ;;  %v852_v42 = vld [vmem:[%s1129_s0 + $0x68] ss:$16 sps:$4 sm:$0xff]   ;;  %v856_v43 = vld [vmem:[%s1129_s0 + $0x8c] ss:$16 sps:$4 sm:$0xff]   ;;  %v855_v44 = vld [vmem:[%s1129_s0 + $0x80] ss:$16 sps:$4 sm:$0xff]  }
  0x10   :  { %752 = vmatpush3.bf16.msra.mxu0 %v815_v12  ;;  %493 = vmatprep.subr.bf16.mxu1 %v869_v0  ;;  %v859_v45 = vld [vmem:[%s1129_s0 + $0xa4] ss:$16 sps:$4 sm:$0xff]   ;;  %v858_v46 = vld [vmem:[%s1129_s0 + $0x88] ss:$16 sps:$4 sm:$0xff]   ;;  %v862_v47 = vld [vmem:[%s1129_s0 + $0xac] ss:$16 sps:$4 sm:$0xff]  }
  0x11   :  { %753 = vmatprep.subr.bf16.mxu0 %v816_v13  ;;  %v861_v49 = vld [vmem:[%s1129_s0 + $0xa0] ss:$16 sps:$4 sm:$0xff]   ;;  %v40_v51 = vld [vmem:[%s1129_s0 + $0xc8] sm:$0x11] }
  0x12   :  { %v864_v52 = vld [vmem:[%s1129_s0 + $0xa8] ss:$16 sps:$4 sm:$0xff]   ;;  %v686_v53 = vcombine.high %v40_v51, %v40_v51  ;;  %v685_v55 = vcombine.low %v40_v51, %v40_v51  ;;  %v1062_v58 = vld [vmem:[%s1130_s2] ss:$0 sm:$0xff] }
  0x13   :  { %494 = vmatpush1.bf16.msra.mxu1 %v817_v14 }
  0x14   :  { %754 = vmatpush3.bf16.msra.mxu0 %v818_v15  ;;  %495 = vmatprep.subr.bf16.mxu1 %v869_v0 }
  0x15   :  { %755 = vmatprep.subr.bf16.mxu0 %v819_v16 }
  0x17   :  { %496 = vmatpush1.bf16.msra.mxu1 %v820_v17 }
  0x18   :  { %756 = vmatpush3.bf16.msra.mxu0 %v821_v18  ;;  %497 = vmatprep.subr.bf16.mxu1 %v869_v0 }
  0x19   :  { %757 = vmatprep.subr.bf16.mxu0 %v822_v19 }
  0x1b   :  { %498 = vmatpush1.bf16.msra.mxu1 %v823_v20 }
  0x1c   :  { %758 = vmatpush3.bf16.msra.mxu0 %v824_v21  ;;  %499 = vmatprep.subr.bf16.mxu1 %v869_v0 }
  0x1d   :  { %759 = vmatprep.subr.bf16.mxu0 %v825_v22 }
  0x1f   :  { %500 = vmatpush1.bf16.msra.mxu1 %v826_v24 }
  0x20   :  { %760 = vmatpush3.bf16.msra.mxu0 %v827_v26  ;;  %501 = vmatprep.subr.bf16.mxu1 %v869_v0 }
  0x23   :  { %430 = vmatmul.mubr.bf16.vlgmr.msra.gmra.mrb[0].mxu0 %v828_v27  ;;  %502 = vmatpush1.bf16.msra.mxu1 %v831_v28 }
  0x24   :  { %437 = vmatprep.mubr.bf16.mxu0 %v835_v29 }
  0x26   :  { %518 = vmatmul.mubr.bf16.vlgmr.msra.gmra.mrb[0].mxu1 %v832_v30 }
  0x27   :  { %713 = vmatprep.mubr.msk.bf16.mxu1 %vm375_vm0, %v838_v31 }
  0x2b   :  { %438 = vmatmul.mubr.bf16.gmra.mrb[4].mxu0 %v837_v32 }
  0x2c   :  { %445 = vmatprep.mubr.bf16.mxu0 %v841_v33 }
  0x2e   :  { %526 = vmatmul.mubr.bf16.gmra.mrb[4].mxu1 %v840_v34 }
  0x2f   :  { %714 = vmatprep.mubr.msk.bf16.mxu1 %vm375_vm0, %v844_v35 }
  0x33   :  { %446 = vmatmul.mubr.bf16.gmra.mrb[8].mxu0 %v843_v36 }
  0x34   :  { %453 = vmatprep.mubr.bf16.mxu0 %v847_v37 }
  0x36   :  { %534 = vmatmul.mubr.bf16.gmra.mrb[8].mxu1 %v846_v38 }
  0x37   :  { %715 = vmatprep.mubr.msk.bf16.mxu1 %vm375_vm0, %v850_v39 }
  0x3b   :  { %454 = vmatmul.mubr.bf16.gmra.mrb[12].mxu0 %v849_v40 }
  0x3c   :  { %461 = vmatprep.mubr.bf16.mxu0 %v853_v41 }
  0x3e   :  { %542 = vmatmul.mubr.bf16.gmra.mrb[12].mxu1 %v852_v42 }
  0x3f   :  { %716 = vmatprep.mubr.msk.bf16.mxu1 %vm375_vm0, %v856_v43 }
  0x43   :  { %462 = vmatmul.mubr.bf16.gmra.mrb[16].mxu0 %v855_v44 }
  0x44   :  { %469 = vmatprep.mubr.bf16.mxu0 %v859_v45 }
  0x46   :  { %550 = vmatmul.mubr.bf16.gmra.mrb[16].mxu1 %v858_v46 }
  0x47   :  { %717 = vmatprep.mubr.msk.bf16.mxu1 %vm375_vm0, %v862_v47 }
  0x4b   :  { %470 = vmatmul.mubr.bf16.gmra.mrb[20].mxu0 %v861_v49 }
  0x4c   :  { %477 = vmatprep.mubr.bf16.mxu0 %v684_v50 }
  0x4e   :  { %558 = vmatmul.mubr.bf16.gmra.mrb[20].mxu1 %v864_v52 }
  0x4f   :  { %718 = vmatprep.mubr.msk.bf16.mxu1 %vm375_vm0, %v686_v53 }
  0x53   :  { %478 = vmatmul.mubr.bf16.gmra.mrb[24].mxu0 %v683_v54 }
  0x56   :  { %566 = vmatmul.mubr.bf16.gmra.mrb[24].mxu1 %v685_v55 }
  0xf6   :  { %v761_v56 = vpop.f32.mrb[0].mxu0 }
  0xf7   :  { %v762_v57 = vpop.f32.mrb[1].mxu0 }
  0xf8   :  { %v763_v59 = vadd.f32 %v762_v57, %v761_v56  ;;  %v764_v60 = vpop.f32.mrb[2].mxu0 }
  0xf9   :  { %v765_v61 = vpop.f32.mrb[3].mxu0  ;;  %v519_v62 = vpop.f32.mrb[0].mxu1 }
  0xfa   :  { %v766_v63 = vadd.f32 %v765_v61, %v764_v60  ;;  %v432_v0 = vadd.f32 %v763_v59, %v1062_v58  ;;  %v521_v1 = vpop.f32.mrb[1].mxu1 }
  0xfb   :  { %v522_v2 = vpop.f32.mrb[2].mxu1 }
  0xfc   :  { %v520_v3 = vadd.f32 %v519_v62, %v432_v0  ;;  %v435_v4 = vadd.f32 %v766_v63, %v1062_v58  ;;  %v524_v5 = vpop.f32.mrb[3].mxu1 }
  0xfe   :  { %v573_v6 = vmax.f32 %v520_v3, 0.0  ;;  %v523_v7 = vadd.f32 %v522_v2, %v435_v4  ;;  %v767_v8 = vpop.f32.mrb[4].mxu0 }
  0xff   :  { %v768_v9 = vpop.f32.mrb[5].mxu0 }
 0x100   :  { %v732_v10 = vpack.c.bf16 %v573_v6, %v573_v6  ;;  %v574_v11 = vmax.f32 %v523_v7, 0.0  ;;  %v769_v12 = vadd.f32 %v768_v9, %v767_v8  ;;  %v770_v13 = vpop.f32.mrb[6].mxu0 }
 0x101   :  { %v771_v14 = vpop.f32.mrb[7].mxu0  ;;  %v527_v15 = vpop.f32.mrb[4].mxu1 }
 0x102   :  { %640 = vst.msk [vmem:[%s1131_s3] sm:$0xf] %vm639_vm1, %v732_v10  ;;  %v733_v16 = vpack.c.bf16 %v574_v11, %v574_v11  ;;  %v772_v17 = vadd.f32 %v771_v14, %v770_v13  ;;  %v440_v18 = vadd.f32 %v769_v12, %v1062_v58  ;;  %v529_v19 = vpop.f32.mrb[5].mxu1 }
 0x103   :  { %v530_v20 = vpop.f32.mrb[6].mxu1 }
 0x104   :  { %641 = vst.msk [vmem:[%s1131_s3 + $0x4] sm:$0xf] %vm639_vm1, %v733_v16  ;;  %v528_v21 = vadd.f32 %v527_v15, %v440_v18  ;;  %v443_v22 = vadd.f32 %v772_v17, %v1062_v58  ;;  %v532_v23 = vpop.f32.mrb[7].mxu1 }
 0x106   :  { %v575_v24 = vmax.f32 %v528_v21, 0.0  ;;  %v531_v25 = vadd.f32 %v530_v20, %v443_v22  ;;  %v773_v26 = vpop.f32.mrb[8].mxu0 }
 0x107   :  { %v774_v27 = vpop.f32.mrb[9].mxu0 }
 0x108   :  { %v734_v28 = vpack.c.bf16 %v575_v24, %v575_v24  ;;  %v576_v29 = vmax.f32 %v531_v25, 0.0  ;;  %v775_v30 = vadd.f32 %v774_v27, %v773_v26  ;;  %v776_v31 = vpop.f32.mrb[10].mxu0 }
 0x109   :  { %v777_v32 = vpop.f32.mrb[11].mxu0  ;;  %v535_v33 = vpop.f32.mrb[8].mxu1 }
 0x10a   :  { %642 = vst.msk [vmem:[%s1131_s3 + $0x8] sm:$0xf] %vm639_vm1, %v734_v28  ;;  %v735_v34 = vpack.c.bf16 %v576_v29, %v576_v29  ;;  %v778_v35 = vadd.f32 %v777_v32, %v776_v31  ;;  %v448_v36 = vadd.f32 %v775_v30, %v1062_v58  ;;  %v537_v37 = vpop.f32.mrb[9].mxu1 }
 0x10b   :  { %v538_v38 = vpop.f32.mrb[10].mxu1 }
 0x10c   :  { %643 = vst.msk [vmem:[%s1131_s3 + $0xc] sm:$0xf] %vm639_vm1, %v735_v34  ;;  %v536_v39 = vadd.f32 %v535_v33, %v448_v36  ;;  %v451_v40 = vadd.f32 %v778_v35, %v1062_v58  ;;  %v540_v41 = vpop.f32.mrb[11].mxu1 }
 0x10e   :  { %v577_v42 = vmax.f32 %v536_v39, 0.0  ;;  %v539_v43 = vadd.f32 %v538_v38, %v451_v40  ;;  %v779_v44 = vpop.f32.mrb[12].mxu0 }
 0x10f   :  { %v780_v45 = vpop.f32.mrb[13].mxu0 }
 0x110   :  { %v736_v46 = vpack.c.bf16 %v577_v42, %v577_v42  ;;  %v578_v47 = vmax.f32 %v539_v43, 0.0  ;;  %v781_v48 = vadd.f32 %v780_v45, %v779_v44  ;;  %v782_v49 = vpop.f32.mrb[14].mxu0 }
 0x111   :  { %v783_v50 = vpop.f32.mrb[15].mxu0  ;;  %v543_v51 = vpop.f32.mrb[12].mxu1 }
 0x112   :  { %644 = vst.msk [vmem:[%s1131_s3 + $0x10] sm:$0xf] %vm639_vm1, %v736_v46  ;;  %v737_v52 = vpack.c.bf16 %v578_v47, %v578_v47  ;;  %v784_v53 = vadd.f32 %v783_v50, %v782_v49  ;;  %v456_v54 = vadd.f32 %v781_v48, %v1062_v58  ;;  %v545_v55 = vpop.f32.mrb[13].mxu1 }
 0x113   :  { %v546_v56 = vpop.f32.mrb[14].mxu1 }
 0x114   :  { %645 = vst.msk [vmem:[%s1131_s3 + $0x14] sm:$0xf] %vm639_vm1, %v737_v52  ;;  %v544_v57 = vadd.f32 %v543_v51, %v456_v54  ;;  %v459_v59 = vadd.f32 %v784_v53, %v1062_v58  ;;  %v548_v60 = vpop.f32.mrb[15].mxu1 }
 0x116   :  { %v579_v61 = vmax.f32 %v544_v57, 0.0  ;;  %v547_v62 = vadd.f32 %v546_v56, %v459_v59  ;;  %v785_v63 = vpop.f32.mrb[16].mxu0 }
 0x117   :  { %v786_v0 = vpop.f32.mrb[17].mxu0 }
 0x118   :  { %v738_v1 = vpack.c.bf16 %v579_v61, %v579_v61  ;;  %v580_v2 = vmax.f32 %v547_v62, 0.0  ;;  %v787_v3 = vadd.f32 %v786_v0, %v785_v63  ;;  %v788_v4 = vpop.f32.mrb[18].mxu0 }
 0x119   :  { %v789_v5 = vpop.f32.mrb[19].mxu0  ;;  %v551_v6 = vpop.f32.mrb[16].mxu1 }
 0x11a   :  { %646 = vst.msk [vmem:[%s1131_s3 + $0x18] sm:$0xf] %vm639_vm1, %v738_v1  ;;  %v739_v7 = vpack.c.bf16 %v580_v2, %v580_v2  ;;  %v790_v8 = vadd.f32 %v789_v5, %v788_v4  ;;  %v464_v9 = vadd.f32 %v787_v3, %v1062_v58  ;;  %v553_v10 = vpop.f32.mrb[17].mxu1 }
 0x11b   :  { %v554_v11 = vpop.f32.mrb[18].mxu1 }
 0x11c   :  { %647 = vst.msk [vmem:[%s1131_s3 + $0x1c] sm:$0xf] %vm639_vm1, %v739_v7  ;;  %v552_v12 = vadd.f32 %v551_v6, %v464_v9  ;;  %v467_v13 = vadd.f32 %v790_v8, %v1062_v58  ;;  %v556_v14 = vpop.f32.mrb[19].mxu1 }
 0x11e   :  { %v581_v15 = vmax.f32 %v552_v12, 0.0  ;;  %v555_v16 = vadd.f32 %v554_v11, %v467_v13  ;;  %v791_v17 = vpop.f32.mrb[20].mxu0 }
 0x11f   :  { %v792_v18 = vpop.f32.mrb[21].mxu0 }
 0x120   :  { %v740_v19 = vpack.c.bf16 %v581_v15, %v581_v15  ;;  %v582_v20 = vmax.f32 %v555_v16, 0.0  ;;  %v793_v21 = vadd.f32 %v792_v18, %v791_v17  ;;  %v794_v22 = vpop.f32.mrb[22].mxu0 }
 0x121   :  { %v795_v23 = vpop.f32.mrb[23].mxu0  ;;  %v559_v24 = vpop.f32.mrb[20].mxu1 }
 0x122   :  { %648 = vst.msk [vmem:[%s1131_s3 + $0x20] sm:$0xf] %vm639_vm1, %v740_v19  ;;  %v741_v25 = vpack.c.bf16 %v582_v20, %v582_v20  ;;  %v796_v26 = vadd.f32 %v795_v23, %v794_v22  ;;  %v472_v27 = vadd.f32 %v793_v21, %v1062_v58  ;;  %v561_v28 = vpop.f32.mrb[21].mxu1 }
 0x123   :  { %v562_v29 = vpop.f32.mrb[22].mxu1 }
 0x124   :  { %649 = vst.msk [vmem:[%s1131_s3 + $0x24] sm:$0xf] %vm639_vm1, %v741_v25  ;;  %v560_v30 = vadd.f32 %v559_v24, %v472_v27  ;;  %v475_v31 = vadd.f32 %v796_v26, %v1062_v58  ;;  %v564_v32 = vpop.f32.mrb[23].mxu1 }
 0x126   :  { %v583_v33 = vmax.f32 %v560_v30, 0.0  ;;  %v563_v34 = vadd.f32 %v562_v29, %v475_v31  ;;  %v797_v35 = vpop.f32.mrb[24].mxu0 }
 0x127   :  { %v798_v36 = vpop.f32.mrb[25].mxu0 }
 0x128   :  { %v742_v37 = vpack.c.bf16 %v583_v33, %v583_v33  ;;  %v584_v38 = vmax.f32 %v563_v34, 0.0  ;;  %v799_v39 = vadd.f32 %v798_v36, %v797_v35  ;;  %v800_v40 = vpop.f32.mrb[26].mxu0 }
 0x129   :  { %v801_v41 = vpop.f32.mrb[27].mxu0  ;;  %v567_v42 = vpop.f32.mrb[24].mxu1 }
 0x12a   :  { %650 = vst.msk [vmem:[%s1131_s3 + $0x28] sm:$0xf] %vm639_vm1, %v742_v37  ;;  %v743_v43 = vpack.c.bf16 %v584_v38, %v584_v38  ;;  %v480_v44 = vadd.f32 %v799_v39, %v1062_v58  ;;  %v569_v45 = vpop.f32.mrb[25].mxu1 }
 0x12b   :  { %v570_v46 = vpop.f32.mrb[26].mxu1 }
 0x12c   :  { %651 = vst.msk [vmem:[%s1131_s3 + $0x2c] sm:$0xf] %vm639_vm1, %v743_v43  ;;  %v568_v47 = vadd.f32 %v567_v42, %v480_v44  ;;  %v571_v48 = vpop.f32.mrb[27].mxu1 }
 0x12e   :  { %v585_v49 = vmax.f32 %v568_v47, 0.0 }
 0x130   :  { %v744_v50 = vpack.c.bf16 %v585_v49, %v585_v49 }
 0x132   :  { %653 = vst.msk [vmem:[%s1131_s3 + $0x30] sm:$0x1] %vm652_vm2, %v744_v50 }

// kernel: net_forward.5
= control target key start
LH: loop header
LB: loop body
LE: loop exit
PB: predicated region body
PF: predicated region fallthrough
CT: control target
= control target key end

     0   :  { %v142_v29 = vlaneseq  ;;  %v2291_v33 = vmov 1966171168   ;;  %v3007_v40 = vmov 0.0   ;;  %vm2293_vm0 = vmmov 0   ;;  %s2999_s0 = inlined_call_operand.vmem [shape: bf16[4,2,800], index: 0, kind: input, shape index: {}]   ;;  %s3000_s1 = inlined_call_operand.vmem [shape: bf16[800,32], index: 1, kind: input, shape index: {}]   ;;  %s3001_s2 = inlined_call_operand.vmem [shape: f32[1,32], index: 2, kind: input, shape index: {}]   ;;  %s3002_s3 = inlined_call_operand.vmem [shape: bf16[4,32,128], index: 3, kind: input, shape index: {}]   ;;  %s3003_s4 = inlined_call_operand.vmem [shape: f32[1,128], index: 4, kind: input, shape index: {}]   ;;  %s3004_s5 = inlined_call_operand.vmem [shape: bf16[128,6], index: 5, kind: input, shape index: {}]   ;;  %s3005_s6 = inlined_call_operand.vmem [shape: f32[1,6], index: 6, kind: input, shape index: {}]   ;;  %s3006_s7 = inlined_call_operand.hbm [shape: f32[2,6], index: 7, kind: output, shape index: {}]  }
   0x1   :  { %v2338_v0 = vld [vmem:[%s3000_s1 + $0x40] sm:$0xff]   ;;  %v2361_v4 = vld [vmem:[%s3000_s1 + $0x48] sm:$0xff]   ;;  %v2385_v8 = vld [vmem:[%s3000_s1 + $0x50] sm:$0xff]   ;;  %v140_v34 = vunpack.c.l.s4 %v2291_v33 }
   0x2   :  { %v2343_v1 = vld [vmem:[%s3000_s1] sm:$0xff]   ;;  %1794 = vmatprep.subr.bf16.mxu0 %v2338_v0  ;;  %v2367_v5 = vld [vmem:[%s3000_s1 + $0x8] sm:$0xff]   ;;  %v2391_v9 = vld [vmem:[%s3000_s1 + $0x10] sm:$0xff]   ;;  %v143_v35 = vshrl.u32 %v142_v29, 7 }
   0x3   :  { %v2349_v2 = vld [vmem:[%s3000_s1 + $0xc0] sm:$0xff]   ;;  %1795 = vmatpush3.bf16.msra.mxu0 %v2343_v1  ;;  %v2373_v6 = vld [vmem:[%s3000_s1 + $0xc8] sm:$0xff]   ;;  %v2397_v10 = vld [vmem:[%s3000_s1 + $0xd0] sm:$0xff]   ;;  %v141_v39 = vunpack.c.0.s8 %v140_v34 }
   0x4   :  { %v2355_v3 = vld [vmem:[%s3000_s1 + $0x80] sm:$0xff]   ;;  %1816 = vmatprep.subr.bf16.mxu1 %v2349_v2  ;;  %1796 = vmatprep.subr.bf16.mxu0 %v2361_v4  ;;  %v2379_v7 = vld [vmem:[%s3000_s1 + $0x88] sm:$0xff]   ;;  %v2403_v11 = vld [vmem:[%s3000_s1 + $0x90] sm:$0xff]  }
   0x5   :  { %1817 = vmatpush3.bf16.msra.mxu1 %v2355_v3  ;;  %v2409_v12 = vld [vmem:[%s3000_s1 + $0x58] sm:$0xff]   ;;  %v2433_v16 = vld [vmem:[%s3000_s1 + $0x60] sm:$0xff]   ;;  %v2457_v20 = vld [vmem:[%s3000_s1 + $0x68] sm:$0xff]   ;;  %v2537_v41 = vsub.s32 %v141_v39, %v143_v35 }
   0x6   :  { %1818 = vmatprep.subr.bf16.mxu1 %v2373_v6  ;;  %v2415_v13 = vld [vmem:[%s3000_s1 + $0x18] sm:$0xff]   ;;  %v2439_v17 = vld [vmem:[%s3000_s1 + $0x20] sm:$0xff]   ;;  %v2463_v21 = vld [vmem:[%s3000_s1 + $0x28] sm:$0xff]  }
   0x7   :  { %1797 = vmatpush3.bf16.msra.mxu0 %v2367_v5  ;;  %v2421_v14 = vld [vmem:[%s3000_s1 + $0xd8] sm:$0xff]   ;;  %v2445_v18 = vld [vmem:[%s3000_s1 + $0xe0] sm:$0xff]   ;;  %v2469_v22 = vld [vmem:[%s3000_s1 + $0xe8] sm:$0xff]  }
   0x8   :  { %1798 = vmatprep.subr.bf16.mxu0 %v2385_v8  ;;  %v2427_v15 = vld [vmem:[%s3000_s1 + $0x98] sm:$0xff]   ;;  %v2451_v19 = vld [vmem:[%s3000_s1 + $0xa0] sm:$0xff]   ;;  %v2475_v23 = vld [vmem:[%s3000_s1 + $0xa8] sm:$0xff]  }
   0x9   :  { %1819 = vmatpush3.bf16.msra.mxu1 %v2379_v7  ;;  %v2481_v24 = vld [vmem:[%s3000_s1 + $0x70] sm:$0xff]   ;;  %v2505_v28 = vld [vmem:[%s3000_s1 + $0x78] sm:$0xff]   ;;  %v29_v32 = vld [vmem:[%s2999_s0] sm:$0x7f] }
   0xa   :  { %1820 = vmatprep.subr.bf16.mxu1 %v2397_v10  ;;  %v2487_v25 = vld [vmem:[%s3000_s1 + $0x30] sm:$0xff]   ;;  %v2511_v30 = vld [vmem:[%s3000_s1 + $0x38] sm:$0xff]   ;;  %v2532_v37 = vld [vmem:[%s3000_s1 + $0x140] sm:$0xff]   ;;  %v138_v38 = vcombine.high %v29_v32, %v29_v32  ;;  %v145_v42 = vrot.slane %v29_v32, %v2537_v41 }
   0xb   :  { %1799 = vmatpush3.bf16.msra.mxu0 %v2391_v9  ;;  %v2493_v26 = vld [vmem:[%s3000_s1 + $0xf0] sm:$0xff]   ;;  %v2517_v31 = vld [vmem:[%s3000_s1 + $0xf8] sm:$0xff]   ;;  %v2546_v48 = vld [vmem:[%s3000_s1 + $0x100] sm:$0xff]  }
   0xc   :  { %1800 = vmatprep.subr.bf16.mxu0 %v2409_v12  ;;  %3021 = vst [vmem:[#allocation5_spill] sm:$0xff] %v2493_v26  ;;  %v2499_v27 = vld [vmem:[%s3000_s1 + $0xb0] sm:$0xff]   ;;  %3023 = vst [vmem:[#allocation7_spill] sm:$0xff] %v2517_v31  ;;  %v2527_v36 = vld [vmem:[%s3000_s1 + $0xb8] sm:$0xff]   ;;  %v152_v43 = vrot.slane %v138_v38, %v2537_v41  ;;  %v153_v44 = vcombine.high %v145_v42, %v145_v42  ;;  %v161_v45 = vrot.slane %v145_v42, %v2537_v41 }
   0xd   :  { %1821 = vmatpush3.bf16.msra.mxu1 %v2403_v11  ;;  %3022 = vst [vmem:[#allocation6_spill] sm:$0xff] %v2499_v27  ;;  %3024 = vst [vmem:[#allocation8_spill] sm:$0xff] %v2527_v36  ;;  %v2551_v50 = vld [vmem:[%s3000_s1 + $0x148] sm:$0xff]   ;;  %v2564_v54 = vld [vmem:[%s3000_s1 + $0x150] sm:$0xff]  }
   0xe   :  { %1822 = vmatprep.subr.bf16.mxu1 %v2421_v14  ;;  %v154_v46 = vcombine.high %v152_v43, %v152_v43  ;;  %v175_v47 = vrot.slane %v153_v44, %v2537_v41  ;;  %v183_v49 = vcombine.high %v161_v45, %v161_v45  ;;  %v2558_v53 = vld [vmem:[%s3000_s1 + $0x108] sm:$0xff]   ;;  %v2571_v55 = vld [vmem:[%s3000_s1 + $0x110] sm:$0xff]   ;;  %v2577_v56 = vld [vmem:[%s3000_s1 + $0x158] sm:$0xff]  }
   0xf   :  { %1801 = vmatpush3.bf16.msra.mxu0 %v2415_v13  ;;  %v2583_v57 = vld [vmem:[%s3000_s1 + $0x118] sm:$0xff]   ;;  %v2588_v58 = vld [vmem:[%s3000_s1 + $0x160] sm:$0xff]   ;;  %v2600_v60 = vld [vmem:[%s3000_s1 + $0x168] sm:$0xff]  }
  0x10   :  { %1802 = vmatprep.subr.bf16.mxu0 %v2433_v16  ;;  %528 = vmatprep.mubr.bf16.mxu0 %v175_v47  ;;  %v185_v51 = vcombine.high %v175_v47, %v175_v47  ;;  %v182_v52 = vrot.slane %v154_v46, %v2537_v41  ;;  %v2595_v59 = vld [vmem:[%s3000_s1 + $0x120] sm:$0xff]  }
  0x11   :  { %1823 = vmatpush3.bf16.msra.mxu1 %v2427_v15 }
  0x12   :  { %1824 = vmatprep.subr.bf16.mxu1 %v2445_v18  ;;  %568 = vmatprep.mubr.bf16.mxu1 %v185_v51 }
  0x13   :  { %1803 = vmatpush3.bf16.msra.mxu0 %v2439_v17 }
  0x14   :  { %1804 = vmatprep.subr.bf16.mxu0 %v2457_v20 }
  0x15   :  { %1825 = vmatpush3.bf16.msra.mxu1 %v2451_v19 }
  0x16   :  { %1826 = vmatprep.subr.bf16.mxu1 %v2469_v22 }
  0x17   :  { %1805 = vmatpush3.bf16.msra.mxu0 %v2463_v21 }
  0x18   :  { %1806 = vmatprep.subr.bf16.mxu0 %v2481_v24 }
  0x19   :  { %1827 = vmatpush3.bf16.msra.mxu1 %v2475_v23 }
  0x1a   :  { %1828 = vmatprep.subr.bf16.mxu1 %v2493_v26 }
  0x1b   :  { %1807 = vmatpush3.bf16.msra.mxu0 %v2487_v25 }
  0x1c   :  { %1808 = vmatprep.subr.bf16.mxu0 %v2505_v28 }
  0x1d   :  { %1829 = vmatpush3.bf16.msra.mxu1 %v2499_v27 }
  0x1e   :  { %1830 = vmatprep.subr.bf16.mxu1 %v2517_v31 }
  0x1f   :  { %1809 = vmatpush3.bf16.msra.mxu0 %v2511_v30 }
  0x20   :  { %1838 = vmatprep.subr.bf16.mxu0 %v2532_v37 }
  0x21   :  { %1831 = vmatpush3.bf16.msra.mxu1 %v2527_v36 }
  0x22   :  { %2099 = vmatprep.subr.bf16.mxu1 %v3007_v40  ;;  %529 = vmatmul.mubr.bf16.vlgmr.msra.gmra.mrb[0].mxu0 %v161_v45 }
  0x23   :  { %1839 = vmatpush3.bf16.msra.mxu0 %v2546_v48  ;;  %608 = vmatprep.mubr.bf16.mxu0 %v182_v52 }
  0x24   :  { %569 = vmatmul.mubr.bf16.vlgmr.msra.gmra.mrb[0].mxu1 %v183_v49  ;;  %1840 = vmatprep.subr.bf16.mxu0 %v2551_v50 }
  0x25   :  { %2103 = vmatprep.mubr.msk.bf16.mxu1 %vm2293_vm0, %v3007_v40 }
  0x27   :  { %1841 = vmatpush3.bf16.msra.mxu0 %v2558_v53 }
  0x28   :  { %1842 = vmatprep.subr.bf16.mxu0 %v2564_v54 }
  0x2b   :  { %1843 = vmatpush3.bf16.msra.mxu0 %v2571_v55 }
  0x2c   :  { %1844 = vmatprep.subr.bf16.mxu0 %v2577_v56 }
  0x2f   :  { %1845 = vmatpush3.bf16.msra.mxu0 %v2583_v57 }
  0x30   :  { %1846 = vmatprep.subr.bf16.mxu0 %v2588_v58 }
  0x31   :  { %12 = vsyncpa [#allocation3], 0  ;;  %v2608_v61 = vld [vmem:[%s3000_s1 + $0x128] sm:$0xff]   ;;  %v2614_v62 = vld [vmem:[%s3000_s1 + $0x170] sm:$0xff]   ;;  %v168_v33 = vrot.slane %v152_v43, %v2537_v41  ;;  %vm492_vm1 = vcmask 261120   ;;  %s2294_s13 = smov [#allocation2]  }
  0x32   :  { %v2620_v63 = vld [vmem:[%s3000_s1 + $0x130] sm:$0xff]   ;;  %v2626_v29 = vld [vmem:[%s3000_s1 + $0x178] sm:$0xff]   ;;  %v2640_v34 = vld [vmem:[%s3000_s1 + $0x180] sm:$0xff]   ;;  %s1694_s14 = sshll.u32 %s2294_s13, 4  ;;  %vm1686_vm2 = vcmask 41984   ;;  %s1695_s14 = int_to_ptr.vmem [resolvable:$true] %s1694_s14 }
  0x33   :  { %1847 = vmatpush3.bf16.msra.mxu0 %v2595_v59  ;;  %v2632_v32 = vld [vmem:[%s3000_s1 + $0x138] sm:$0xff]   ;;  %3025 = vst [vmem:[#allocation9_spill] sm:$0xff] %v2640_v34  ;;  %v2647_v35 = vld [vmem:[%s3000_s1 + $0x188] sm:$0xff]   ;;  %v184_v38 = vcombine.high %v168_v33, %v168_v33  ;;  %v2243_v39 = vld [vmem:[%s3002_s3] sm:$0xff]   ;;  %p2272_p1 = scmp.lt.s32.totalorder %s1695_s14, %s1695_s14 }
  0x34   :  { %1848 = vmatprep.subr.bf16.mxu0 %v2600_v60  ;;  %3026 = vst [vmem:[#allocation10_spill] sm:$0xff] %v2647_v35  ;;  %2100 = vmatpush3.bf16.msra.mxu1 %v2243_v39  ;;  %v2244_v42 = vld [vmem:[%s3002_s3 + $0x8] sm:$0xff]  }
  0x35   :  { %2101 = vmatprep.subr.bf16.mxu1 %v3007_v40  ;;  %v1758_v43 = vld [vmem:[%s2999_s0 + $0x7] sm:$0x7f] }
  0x36   :  { %v734_v44 = vrot.slane %v1758_v43, %v2537_v41  ;;  %v727_v52 = vcombine.high %v1758_v43, %v1758_v43  ;;  %v2716_v43 = vld [vmem:[%s3001_s2] ss:$0 sm:$0xff] }
  0x37   :  { %1849 = vmatpush3.bf16.msra.mxu0 %v2608_v61 }
  0x38   :  { %1850 = vmatprep.subr.bf16.mxu0 %v2614_v62  ;;  %2102 = vmatpush3.bf16.msra.mxu1 %v2244_v42  ;;  %v742_v45 = vcombine.high %v734_v44, %v734_v44  ;;  %v2685_v47 = vrot.slane %v734_v44, %v2537_v41 }
  0x39   :  { %1866 = vmatprep.subr.bf16.mxu1 %v2338_v0 }
  0x3a   :  { %v764_v46 = vrot.slane %v742_v45, %v2537_v41  ;;  %v772_v51 = vcombine.high %v2685_v47, %v2685_v47 }
  0x3b   :  { %1851 = vmatpush3.bf16.msra.mxu0 %v2620_v63 }
  0x3c   :  { %1852 = vmatprep.subr.bf16.mxu0 %v2626_v29  ;;  %v774_v49 = vcombine.high %v764_v46, %v764_v46 }
  0x3f   :  { %1853 = vmatpush3.bf16.msra.mxu0 %v2632_v32 }
  0x40   :  { %2091 = vmatprep.subr.bf16.mxu0 %v3007_v40 }
  0x42   :  { %609 = vmatmul.mubr.bf16.vlgmr.msra.gmra.mrb[4].mxu0 %v168_v33  ;;  %v2696_v33 = vrot.slane %v727_v52, %v2537_v41 }
  0x43   :  { %2092 = vmatpush3.bf16.msra.mxu0 %v2640_v34  ;;  %2095 = vmatprep.mubr.msk.bf16.mxu0 %vm2293_vm0, %v3007_v40 }
  0x44   :  { %2093 = vmatprep.subr.bf16.mxu0 %v3007_v40 }
  0x47   :  { %2094 = vmatpush3.bf16.msra.mxu0 %v2647_v35 }
  0x48   :  { %1888 = vmatprep.subr.bf16.mxu0 %v2349_v2 }
  0x4a   :  { %2096 = vmatmul.mubr.msk.bf16.vlgmr.msra.gmra.mrb[8].mxu0 %vm492_vm1, %v184_v38  ;;  %v2700_v38 = vrot.slane %v2696_v33, %v2537_v41 }
  0x4b   :  { %1889 = vmatpush3.bf16.msra.mxu0 %v2355_v3  ;;  %856 = vmatprep.mubr.bf16.mxu0 %v774_v49 }
  0x4c   :  { %1890 = vmatprep.subr.bf16.mxu0 %v2373_v6  ;;  %v773_v39 = vcombine.high %v2700_v38, %v2700_v38 }
  0x4f   :  { %1891 = vmatpush3.bf16.msra.mxu0 %v2379_v7 }
  0x50   :  { %1892 = vmatprep.subr.bf16.mxu0 %v2397_v10 }
  0x53   :  { %1893 = vmatpush3.bf16.msra.mxu0 %v2403_v11 }
  0x54   :  { %1894 = vmatprep.subr.bf16.mxu0 %v2421_v14 }
  0x57   :  { %1895 = vmatpush3.bf16.msra.mxu0 %v2427_v15 }
  0x58   :  { %1896 = vmatprep.subr.bf16.mxu0 %v2445_v18 }
  0x5b   :  { %1897 = vmatpush3.bf16.msra.mxu0 %v2451_v19 }
  0x5c   :  { %1898 = vmatprep.subr.bf16.mxu0 %v2469_v22 }
  0x5f   :  { %1899 = vmatpush3.bf16.msra.mxu0 %v2475_v23 }
  0x60   :  { %1900 = vmatprep.subr.bf16.mxu0 %v2493_v26 }
  0x63   :  { %1901 = vmatpush3.bf16.msra.mxu0 %v2499_v27 }
  0x64   :  { %1902 = vmatprep.subr.bf16.mxu0 %v2517_v31 }
  0x67   :  { %1903 = vmatpush3.bf16.msra.mxu0 %v2527_v36 }
  0x68   :  { %2107 = vmatprep.subr.bf16.mxu0 %v3007_v40 }
  0x6a   :  { %857 = vmatmul.mubr.bf16.vlgmr.msra.gmra.mrb[12].mxu0 %v772_v51 }
  0x6b   :  { %2108 = vmatpush3.bf16.msra.mxu0 %v2640_v34  ;;  %2111 = vmatprep.mubr.msk.bf16.mxu0 %vm2293_vm0, %v3007_v40 }
  0x6c   :  { %2109 = vmatprep.subr.bf16.mxu0 %v3007_v40 }
  0x6f   :  { %2110 = vmatpush3.bf16.msra.mxu0 %v2647_v35 }
  0x70   :  { %1938 = vmatprep.subr.bf16.mxu0 %v2338_v0 }
  0x72   :  { %2112 = vmatmul.mubr.msk.bf16.vlgmr.msra.gmra.mrb[16].mxu0 %vm492_vm1, %v773_v39 }
  0x73   :  { %1939 = vmatpush3.bf16.msra.mxu0 %v2343_v1 }
  0x74   :  { %1940 = vmatprep.subr.bf16.mxu0 %v2361_v4 }
  0x77   :  { %1941 = vmatpush3.bf16.msra.mxu0 %v2367_v5 }
  0x78   :  { %1942 = vmatprep.subr.bf16.mxu0 %v2385_v8 }
  0x7b   :  { %1943 = vmatpush3.bf16.msra.mxu0 %v2391_v9 }
  0x7c   :  { %1944 = vmatprep.subr.bf16.mxu0 %v2409_v12 }
  0x7f   :  { %1945 = vmatpush3.bf16.msra.mxu0 %v2415_v13 }
  0x80   :  { %1946 = vmatprep.subr.bf16.mxu0 %v2433_v16 }
  0x83   :  { %1947 = vmatpush3.bf16.msra.mxu0 %v2439_v17 }
  0x84   :  { %1948 = vmatprep.subr.bf16.mxu0 %v2457_v20 }
  0x87   :  { %1949 = vmatpush3.bf16.msra.mxu0 %v2463_v21 }
  0x88   :  { %1950 = vmatprep.subr.bf16.mxu0 %v2481_v24 }
  0x8b   :  { %1951 = vmatpush3.bf16.msra.mxu0 %v2487_v25 }
  0x8c   :  { %1952 = vmatprep.subr.bf16.mxu0 %v2505_v28 }
  0x8f   :  { %1953 = vmatpush3.bf16.msra.mxu0 %v2511_v30 }
  0x90   :  { %1982 = vmatprep.subr.bf16.mxu0 %v2532_v37 }
  0xf5   :  { %v1810_v42 = vpop.f32.mrb[0].mxu0 }
  0xf6   :  { %v1811_v44 = vpop.f32.mrb[1].mxu0 }
  0xf7   :  { %v1812_v45 = vadd.f32 %v1811_v44, %v1810_v42  ;;  %v1813_v49 = vpop.f32.mrb[2].mxu0  ;;  %v1832_v51 = vpop.f32.mrb[0].mxu1 }
  0xf8   :  { %v1814_v52 = vpop.f32.mrb[3].mxu0  ;;  %v1833_v39 = vpop.f32.mrb[1].mxu1 }
  0xf9   :  { %v531_v40 = vadd.f32 %v1812_v45, %v2716_v43  ;;  %v1834_v35 = vadd.f32 %v1833_v39, %v1832_v51  ;;  %v1835_v34 = vpop.f32.mrb[2].mxu1 }
  0xfa   :  { %v1836_v36 = vpop.f32.mrb[3].mxu1 }
  0xfb   :  { %v571_v31 = vadd.f32 %v1834_v35, %v531_v40 }
 0x115   :  { %v1854_v42 = vpop.f32.mrb[4].mxu0 }
 0x116   :  { %v1855_v44 = vpop.f32.mrb[5].mxu0 }
 0x117   :  { %v1856_v49 = vadd.f32 %v1855_v44, %v1854_v42  ;;  %v1857_v45 = vpop.f32.mrb[6].mxu0 }
 0x118   :  { %v1858_v51 = vpop.f32.mrb[7].mxu0  ;;  %v2246_v45 = vld [vmem:[%s3002_s3 + $0x10] sm:$0xff]  }
 0x119   :  { %v611_v34 = vadd.f32 %v1856_v49, %v571_v31  ;;  %v3027_v31 = vmov 0.0  }
 0x11d   :  { %v650_v36 = vpop.f32.mrb[8].mxu0 }
 0x11e   :  { %v651_v52 = vadd.f32 %v650_v36, %v611_v34  ;;  %v2097_v39 = vpop.f32.mrb[9].mxu0 }
 0x11f   :  { %v653_v40 = vpop.f32.mrb[10].mxu0  ;;  %v2247_v39 = vld [vmem:[%s3002_s3 + $0x18] sm:$0xff]  }
 0x120   :  { %v656_v35 = vmax.f32 %v651_v52, 0.0  ;;  %v2098_v27 = vpop.f32.mrb[11].mxu0 }
 0x122   :  { %v657_v26 = vpack.c.bf16 %v656_v35, %v656_v35 }
 0x124   :  { %2104 = vmatmul.mubr.msk.bf16.vlgmr.msra.gmra.mrb[4].mxu1 %vm492_vm1, %v657_v26  ;;  %v743_v26 = vcombine.high %v2696_v33, %v2696_v33 }
 0x125   :  { %1867 = vmatpush3.bf16.msra.mxu1 %v2343_v1  ;;  %816 = vmatprep.mubr.bf16.mxu1 %v764_v46 }
 0x126   :  { %1868 = vmatprep.subr.bf16.mxu1 %v2361_v4  ;;  %v771_v27 = vrot.slane %v743_v26, %v2537_v41 }
 0x129   :  { %1869 = vmatpush3.bf16.msra.mxu1 %v2367_v5 }
 0x12a   :  { %1870 = vmatprep.subr.bf16.mxu1 %v2385_v8 }
 0x12d   :  { %1871 = vmatpush3.bf16.msra.mxu1 %v2391_v9 }
 0x12e   :  { %1872 = vmatprep.subr.bf16.mxu1 %v2409_v12 }
 0x131   :  { %1873 = vmatpush3.bf16.msra.mxu1 %v2415_v13 }
 0x132   :  { %1874 = vmatprep.subr.bf16.mxu1 %v2433_v16 }
 0x135   :  { %1875 = vmatpush3.bf16.msra.mxu1 %v2439_v17 }
 0x136   :  { %1876 = vmatprep.subr.bf16.mxu1 %v2457_v20 }
 0x139   :  { %1877 = vmatpush3.bf16.msra.mxu1 %v2463_v21 }
 0x13a   :  { %1878 = vmatprep.subr.bf16.mxu1 %v2481_v24 }
 0x13d   :  { %1879 = vmatpush3.bf16.msra.mxu1 %v2487_v25  ;;  %v1904_v46 = vpop.f32.mrb[12].mxu0 }
 0x13e   :  { %1880 = vmatprep.subr.bf16.mxu1 %v2505_v28 }
 0x141   :  { %1881 = vmatpush3.bf16.msra.mxu1 %v2511_v30 }
 0x142   :  { %1910 = vmatprep.subr.bf16.mxu1 %v2532_v37 }
 0x144   :  { %817 = vmatmul.mubr.bf16.vlgmr.msra.gmra.mrb[8].mxu1 %v2685_v47  ;;  %v1905_v47 = vpop.f32.mrb[13].mxu0 }
 0x145   :  { %1911 = vmatpush3.bf16.msra.mxu1 %v2546_v48  ;;  %896 = vmatprep.mubr.bf16.mxu1 %v771_v27  ;;  %v2767_v33 = vadd.f32 %v1905_v47, %v1904_v46  ;;  %v1907_v42 = vpop.f32.mrb[14].mxu0 }
 0x146   :  { %1912 = vmatprep.subr.bf16.mxu1 %v2551_v50  ;;  %v1908_v44 = vpop.f32.mrb[15].mxu0 }
 0x147   :  { %v2769_v49 = vpop.f32.mrb[16].mxu0 }
 0x148   :  { %v2113_v51 = vpop.f32.mrb[17].mxu0 }
 0x149   :  { %1913 = vmatpush3.bf16.msra.mxu1 %v2558_v53  ;;  %v941_v34 = vpop.f32.mrb[18].mxu0 }
 0x14a   :  { %1914 = vmatprep.subr.bf16.mxu1 %v2564_v54  ;;  %v2114_v36 = vpop.f32.mrb[19].mxu0 }
 0x14d   :  { %1915 = vmatpush3.bf16.msra.mxu1 %v2571_v55 }
 0x14e   :  { %1916 = vmatprep.subr.bf16.mxu1 %v2577_v56 }
 0x151   :  { %1917 = vmatpush3.bf16.msra.mxu1 %v2583_v57 }
 0x152   :  { %1918 = vmatprep.subr.bf16.mxu1 %v2588_v58 }
 0x155   :  { %1919 = vmatpush3.bf16.msra.mxu1 %v2595_v59 }
 0x156   :  { %1920 = vmatprep.subr.bf16.mxu1 %v2600_v60 }
 0x159   :  { %1921 = vmatpush3.bf16.msra.mxu1 %v2608_v61 }
 0x15a   :  { %1922 = vmatprep.subr.bf16.mxu1 %v2614_v62 }
 0x15d   :  { %1923 = vmatpush3.bf16.msra.mxu1 %v2620_v63 }
 0x15e   :  { %1924 = vmatprep.subr.bf16.mxu1 %v2626_v29 }
 0x161   :  { %1925 = vmatpush3.bf16.msra.mxu1 %v2632_v32 }
 0x162   :  { %2115 = vmatprep.subr.bf16.mxu1 %v3027_v31 }
 0x164   :  { %897 = vmatmul.mubr.bf16.vlgmr.msra.gmra.mrb[12].mxu1 %v2700_v38  ;;  %v1767_v38 = vld [vmem:[%s2999_s0 + $0xe] sm:$0x7f] }
 0x165   :  { %2119 = vmatprep.mubr.msk.bf16.mxu1 %vm2293_vm0, %v3027_v31  ;;  %2116 = vmatpush3.bf16.msra.mxu1 %v2246_v45  ;;  %v1017_v52 = vrot.slane %v1767_v38, %v2537_v41  ;;  %v1010_v27 = vcombine.high %v1767_v38, %v1767_v38  ;;  %v3033_v45 = vld [vmem:[#allocation10_spill] sm:$0xff] }
 0x166   :  { %2117 = vmatprep.subr.bf16.mxu1 %v3027_v31 }
 0x167   :  { %v1025_v40 = vcombine.high %v1017_v52, %v1017_v52  ;;  %v2787_v26 = vrot.slane %v1017_v52, %v2537_v41  ;;  %v1024_v46 = vrot.slane %v1010_v27, %v2537_v41 }
 0x169   :  { %2118 = vmatpush3.bf16.msra.mxu1 %v2247_v39  ;;  %v2783_v35 = vrot.slane %v1025_v40, %v2537_v41  ;;  %v1026_v47 = vcombine.high %v1024_v46, %v1024_v46  ;;  %v2809_v44 = vrot.slane %v1024_v46, %v2537_v41  ;;  %v2249_v46 = vld [vmem:[%s3002_s3 + $0x20] sm:$0xff]  }
 0x16a   :  { %1960 = vmatprep.subr.bf16.mxu1 %v2349_v2 }
 0x16b   :  { %1099 = vmatprep.mubr.bf16.mxu0 %v2783_v35  ;;  %v1054_v42 = vrot.slane %v1026_v47, %v2537_v41  ;;  %v1776_v47 = vld [vmem:[%s2999_s0 + $0x15] sm:$0x7f] }
 0x16c   :  { %1100 = vmatmul.mubr.bf16.vlgmr.msra.gmra.mrb[20].mxu0 %v2787_v26 }
 0x16d   :  { %1983 = vmatpush3.bf16.msra.mxu0 %v2546_v48  ;;  %1179 = vmatprep.mubr.bf16.mxu0 %v1054_v42  ;;  %v1300_v42 = vrot.slane %v1776_v47, %v2537_v41 }
 0x16e   :  { %1984 = vmatprep.subr.bf16.mxu0 %v2551_v50 }
 0x171   :  { %1985 = vmatpush3.bf16.msra.mxu0 %v2558_v53 }
 0x172   :  { %1986 = vmatprep.subr.bf16.mxu0 %v2564_v54 }
 0x175   :  { %1987 = vmatpush3.bf16.msra.mxu0 %v2571_v55 }
 0x176   :  { %1988 = vmatprep.subr.bf16.mxu0 %v2577_v56 }
 0x179   :  { %1989 = vmatpush3.bf16.msra.mxu0 %v2583_v57 }
 0x17a   :  { %1990 = vmatprep.subr.bf16.mxu0 %v2588_v58 }
 0x17d   :  { %1991 = vmatpush3.bf16.msra.mxu0 %v2595_v59 }
 0x17e   :  { %1992 = vmatprep.subr.bf16.mxu0 %v2600_v60 }
 0x181   :  { %1993 = vmatpush3.bf16.msra.mxu0 %v2608_v61 }
 0x182   :  { %1994 = vmatprep.subr.bf16.mxu0 %v2614_v62 }
 0x185   :  { %1995 = vmatpush3.bf16.msra.mxu0 %v2620_v63 }
 0x186   :  { %1996 = vmatprep.subr.bf16.mxu0 %v2626_v29 }
 0x189   :  { %1997 = vmatpush3.bf16.msra.mxu0 %v2632_v32 }
 0x18a   :  { %2010 = vmatprep.subr.bf16.mxu0 %v2338_v0 }
 0x18c   :  { %1180 = vmatmul.mubr.bf16.vlgmr.msra.gmra.mrb[24].mxu0 %v2809_v44 }
 0x18d   :  { %2011 = vmatpush3.bf16.msra.mxu0 %v2343_v1 }
 0x18e   :  { %2012 = vmatprep.subr.bf16.mxu0 %v2361_v4 }
 0x191   :  { %2013 = vmatpush3.bf16.msra.mxu0 %v2367_v5 }
 0x192   :  { %2014 = vmatprep.subr.bf16.mxu0 %v2385_v8 }
 0x195   :  { %2015 = vmatpush3.bf16.msra.mxu0 %v2391_v9 }
 0x196   :  { %2016 = vmatprep.subr.bf16.mxu0 %v2409_v12 }
 0x199   :  { %2017 = vmatpush3.bf16.msra.mxu0 %v2415_v13 }
 0x19a   :  { %2018 = vmatprep.subr.bf16.mxu0 %v2433_v16 }
 0x19d   :  { %2019 = vmatpush3.bf16.msra.mxu0 %v2439_v17 }
 0x19e   :  { %2020 = vmatprep.subr.bf16.mxu0 %v2457_v20 }
 0x1a1   :  { %2021 = vmatpush3.bf16.msra.mxu0 %v2463_v21 }
 0x1a2   :  { %2022 = vmatprep.subr.bf16.mxu0 %v2481_v24 }
 0x1a5   :  { %2023 = vmatpush3.bf16.msra.mxu0 %v2487_v25 }
 0x1a6   :  { %2024 = vmatprep.subr.bf16.mxu0 %v2505_v28 }
 0x1a9   :  { %2025 = vmatpush3.bf16.msra.mxu0 %v2511_v30  ;;  %v1057_v30 = vcombine.high %v2783_v35, %v2783_v35 }
 0x1aa   :  { %2054 = vmatprep.subr.bf16.mxu0 %v2532_v37 }
 0x217   :  { %v1882_v0 = vpop.f32.mrb[8].mxu1 }
 0x218   :  { %v1883_v1 = vpop.f32.mrb[9].mxu1 }
 0x219   :  { %v1884_v4 = vadd.f32 %v1883_v1, %v1882_v0  ;;  %v1885_v5 = vpop.f32.mrb[10].mxu1  ;;  %v1308_v0 = vcombine.high %v1300_v42, %v1300_v42 }
 0x21a   :  { %v1886_v8 = vpop.f32.mrb[11].mxu1 }
 0x21b   :  { %v819_v9 = vadd.f32 %v1884_v4, %v2716_v43  ;;  %v1330_v1 = vrot.slane %v1308_v0, %v2537_v41  ;;  %v2878_v4 = vrot.slane %v1300_v42, %v2537_v41  ;;  %v2257_v42 = vld [vmem:[%s3004_s5 + $0x18] sm:$0xff]   ;;  %v2259_v0 = vld [vmem:[%s3004_s5 + $0x28] sm:$0xff]  }
 0x21d   :  { %v859_v12 = vadd.f32 %v2767_v33, %v819_v9  ;;  %v3032_v33 = vld [vmem:[#allocation9_spill] sm:$0xff]  ;;  %1382 = vmatprep.mubr.bf16.mxu0 %v1330_v1 }
 0x21e   :  { %1383 = vmatmul.mubr.bf16.vlgmr.msra.gmra.mrb[28].mxu0 %v2878_v4 }
 0x21f   :  { %2055 = vmatpush3.bf16.msra.mxu0 %v2546_v48 }
 0x220   :  { %2056 = vmatprep.subr.bf16.mxu0 %v2551_v50 }
 0x223   :  { %2057 = vmatpush3.bf16.msra.mxu0 %v2558_v53 }
 0x224   :  { %2058 = vmatprep.subr.bf16.mxu0 %v2564_v54 }
 0x227   :  { %2059 = vmatpush3.bf16.msra.mxu0 %v2571_v55 }
 0x228   :  { %2060 = vmatprep.subr.bf16.mxu0 %v2577_v56 }
 0x22b   :  { %2061 = vmatpush3.bf16.msra.mxu0 %v2583_v57 }
 0x22c   :  { %2062 = vmatprep.subr.bf16.mxu0 %v2588_v58 }
 0x22f   :  { %2063 = vmatpush3.bf16.msra.mxu0 %v2595_v59 }
 0x230   :  { %2064 = vmatprep.subr.bf16.mxu0 %v2600_v60 }
 0x233   :  { %2065 = vmatpush3.bf16.msra.mxu0 %v2608_v61 }
 0x234   :  { %2066 = vmatprep.subr.bf16.mxu0 %v2614_v62 }
 0x237   :  { %v1926_v13 = vpop.f32.mrb[12].mxu1  ;;  %2067 = vmatpush3.bf16.msra.mxu0 %v2620_v63 }
 0x238   :  { %v1927_v16 = vpop.f32.mrb[13].mxu1  ;;  %2068 = vmatprep.subr.bf16.mxu0 %v2626_v29 }
 0x239   :  { %v1928_v17 = vadd.f32 %v1927_v16, %v1926_v13  ;;  %v1929_v20 = vpop.f32.mrb[14].mxu1  ;;  %v2263_v16 = vld [vmem:[%s3000_s1 + $0xc8] sm:$0xff]  }
 0x23a   :  { %v1930_v21 = vpop.f32.mrb[15].mxu1  ;;  %v2265_v20 = vld [vmem:[%s3000_s1 + $0xd0] sm:$0xff]  }
 0x23b   :  { %v899_v24 = vadd.f32 %v1928_v17, %v859_v12  ;;  %2069 = vmatpush3.bf16.msra.mxu0 %v2632_v32  ;;  %v1340_v32 = vcombine.high %v1330_v1, %v1330_v1  ;;  %v2264_v17 = vld [vmem:[%s3000_s1 + $0x88] sm:$0xff]   ;;  %v2266_v21 = vld [vmem:[%s3000_s1 + $0x90] sm:$0xff]  }
 0x23c   :  { %v2260_v1 = vld [vmem:[%s3004_s5 + $0x30] sm:$0xff]  }
 0x23d   :  { %v939_v25 = vadd.f32 %v2769_v49, %v899_v24  ;;  %v1056_v49 = vcombine.high %v2809_v44, %v2809_v44  ;;  %v2250_v44 = vld [vmem:[%s3002_s3 + $0x28] sm:$0xff]   ;;  %v1338_v24 = vcombine.high %v2878_v4, %v2878_v4  ;;  %v2261_v4 = vld [vmem:[%s3004_s5 + $0x38] sm:$0xff]  }
 0x23f   :  { %v944_v28 = vmax.f32 %v939_v25, 0.0  ;;  %v1954_v51 = vpop.f32.mrb[20].mxu0 }
 0x240   :  { %v1955_v34 = vpop.f32.mrb[21].mxu0 }
 0x241   :  { %v945_v37 = vpack.c.bf16 %v944_v28, %v944_v28  ;;  %v1956_v38 = vadd.f32 %v1955_v34, %v1954_v51  ;;  %v1957_v36 = vpop.f32.mrb[22].mxu0 }
 0x242   :  { %v1958_v52 = vpop.f32.mrb[23].mxu0 }
 0x243   :  { %2120 = vmatmul.mubr.msk.bf16.vlgmr.msra.gmra.mrb[4].mxu1 %vm492_vm1, %v945_v37  ;;  %v1102_v57 = vadd.f32 %v1956_v38, %v2716_v43 }
 0x244   :  { %1961 = vmatpush3.bf16.msra.mxu1 %v2355_v3  ;;  %1139 = vmatprep.mubr.bf16.mxu1 %v1057_v30  ;;  %v3028_v3 = vld [vmem:[#allocation5_spill] sm:$0xff] }
 0x245   :  { %1962 = vmatprep.subr.bf16.mxu1 %v2373_v6  ;;  %v3029_v6 = vld [vmem:[#allocation6_spill] sm:$0xff] }
 0x248   :  { %1963 = vmatpush3.bf16.msra.mxu1 %v2379_v7  ;;  %v3030_v7 = vld [vmem:[#allocation7_spill] sm:$0xff] }
 0x249   :  { %1964 = vmatprep.subr.bf16.mxu1 %v2397_v10  ;;  %v1055_v10 = vcombine.high %v2787_v26, %v2787_v26 }
 0x24c   :  { %1965 = vmatpush3.bf16.msra.mxu1 %v2403_v11  ;;  %v3031_v11 = vld [vmem:[#allocation8_spill] sm:$0xff] }
 0x24d   :  { %1966 = vmatprep.subr.bf16.mxu1 %v2421_v14 }
 0x250   :  { %1967 = vmatpush3.bf16.msra.mxu1 %v2427_v15 }
 0x251   :  { %1968 = vmatprep.subr.bf16.mxu1 %v2445_v18 }
 0x254   :  { %1969 = vmatpush3.bf16.msra.mxu1 %v2451_v19 }
 0x255   :  { %1970 = vmatprep.subr.bf16.mxu1 %v2469_v22 }
 0x258   :  { %1971 = vmatpush3.bf16.msra.mxu1 %v2475_v23 }
 0x259   :  { %1972 = vmatprep.subr.bf16.mxu1 %v3028_v3 }
 0x25c   :  { %1973 = vmatpush3.bf16.msra.mxu1 %v3029_v6 }
 0x25d   :  { %1974 = vmatprep.subr.bf16.mxu1 %v3030_v7 }
 0x25f   :  { %v1998_v39 = vpop.f32.mrb[24].mxu0 }
 0x260   :  { %1975 = vmatpush3.bf16.msra.mxu1 %v3031_v11  ;;  %v1999_v40 = vpop.f32.mrb[25].mxu0 }
 0x261   :  { %2123 = vmatprep.subr.bf16.mxu1 %v3027_v31  ;;  %v2001_v35 = vpop.f32.mrb[26].mxu0  ;;  %v2000_v27 = vadd.f32 %v1999_v40, %v1998_v39 }
 0x262   :  { %v2002_v26 = vpop.f32.mrb[27].mxu0 }
 0x263   :  { %1140 = vmatmul.mubr.bf16.vlgmr.msra.gmra.mrb[16].mxu1 %v1055_v10 }
 0x264   :  { %2124 = vmatpush3.bf16.msra.mxu1 %v3032_v33  ;;  %2127 = vmatprep.mubr.msk.bf16.mxu1 %vm2293_vm0, %v3027_v31 }
 0x265   :  { %2125 = vmatprep.subr.bf16.mxu1 %v3027_v31 }
 0x268   :  { %2126 = vmatpush3.bf16.msra.mxu1 %v3033_v45 }
 0x269   :  { %2131 = vmatprep.subr.bf16.mxu1 %v3027_v31 }
 0x26b   :  { %2128 = vmatmul.mubr.msk.bf16.vlgmr.msra.gmra.mrb[20].mxu1 %vm492_vm1, %v1056_v49 }
 0x26c   :  { %2135 = vmatprep.mubr.msk.bf16.mxu1 %vm2293_vm0, %v3027_v31  ;;  %2132 = vmatpush3.bf16.msra.mxu1 %v2249_v46 }
 0x26d   :  { %2133 = vmatprep.subr.bf16.mxu1 %v3027_v31 }
 0x270   :  { %2134 = vmatpush3.bf16.msra.mxu1 %v2250_v44  ;;  %v2258_v44 = vld [vmem:[%s3004_s5 + $0x20] sm:$0xff]  }
 0x271   :  { %2032 = vmatprep.subr.bf16.mxu1 %v2349_v2  ;;  %v1293_v2 = vcombine.high %v1776_v47, %v1776_v47  ;;  %v2256_v47 = vld [vmem:[%s3004_s5 + $0x10] sm:$0xff]  }
 0x273   :  { %v1307_v48 = vrot.slane %v1293_v2, %v2537_v41  ;;  %v1757_v2 = vld [vmem:[%s3003_s4] ss:$0 sm:$0xff]  ;;  %s2267_s4 = scalar_lea.vmem %s1695_s14, 32 }
 0x274   :  { %p2268_p0 = scmp.ne.s32.totalorder %s1695_s14, %s2267_s4  ;;  %p2273_p2 = scmp.lt.s32.totalorder %s2267_s4, %s2267_s4 }
 0x275   :  { %v1309_v50 = vcombine.high %v1307_v48, %v1307_v48  ;;  %v1323_v54 = vrot.slane %v1307_v48, %v2537_v41 }
 0x276   :  { %p2274_p3 = por %p2273_p2, %p2272_p1 }
 0x277   :  { %v1337_v53 = vrot.slane %v1309_v50, %v2537_v41  ;;  %v2262_v41 = vld [vmem:[%s3000_s1 + $0x80] sm:$0xff]  }
 0x278   :  { %p2275_p4 = pnand %p2274_p3, %p2268_p0 }
 0x279   :  { %1462 = vmatprep.mubr.bf16.mxu0 %v1337_v53 }
 0x27a   :  { %1463 = vmatmul.mubr.bf16.vlgmr.msra.gmra.mrb[32].mxu0 %v1323_v54 }
 0x336   :  { %v1976_v55 = vpop.f32.mrb[16].mxu1 }
 0x337   :  { %v1977_v56 = vpop.f32.mrb[17].mxu1 }
 0x338   :  { %v1978_v58 = vadd.f32 %v1977_v56, %v1976_v55  ;;  %v1979_v59 = vpop.f32.mrb[18].mxu1 }
 0x339   :  { %v1980_v60 = vpop.f32.mrb[19].mxu1 }
 0x33a   :  { %v1142_v61 = vadd.f32 %v1978_v58, %v1102_v57 }
 0x33c   :  { %v1182_v62 = vadd.f32 %v2000_v27, %v1142_v61  ;;  %v2254_v27 = vld [vmem:[%s3004_s5] sm:$0xff]  }
 0x33e   :  { %v1221_v63 = vpop.f32.mrb[20].mxu1 }
 0x33f   :  { %v1222_v29 = vadd.f32 %v1221_v63, %v1182_v62  ;;  %v2129_v5 = vpop.f32.mrb[21].mxu1 }
 0x340   :  { %v1224_v8 = vpop.f32.mrb[22].mxu1 }
 0x341   :  { %v1227_v9 = vmax.f32 %v1222_v29, 0.0  ;;  %v2130_v12 = vpop.f32.mrb[23].mxu1 }
 0x343   :  { %v1228_v13 = vpack.c.bf16 %v1227_v9, %v1227_v9 }
 0x345   :  { %2136 = vmatmul.mubr.msk.bf16.vlgmr.msra.gmra.mrb[4].mxu1 %vm492_vm1, %v1228_v13 }
 0x346   :  { %2033 = vmatpush3.bf16.msra.mxu1 %v2262_v41  ;;  %1422 = vmatprep.mubr.bf16.mxu1 %v1340_v32 }
 0x347   :  { %2034 = vmatprep.subr.bf16.mxu1 %v2263_v16 }
 0x34a   :  { %2035 = vmatpush3.bf16.msra.mxu1 %v2264_v17 }
 0x34b   :  { %2036 = vmatprep.subr.bf16.mxu1 %v2265_v20 }
 0x34e   :  { %2037 = vmatpush3.bf16.msra.mxu1 %v2266_v21 }
 0x34f   :  { %2038 = vmatprep.subr.bf16.mxu1 %v2421_v14  ;;  %v1339_v14 = vcombine.high %v1323_v54, %v1323_v54 }
 0x352   :  { %2039 = vmatpush3.bf16.msra.mxu1 %v2427_v15  ;;  %v2026_v15 = vpop.f32.mrb[28].mxu0 }
 0x353   :  { %2040 = vmatprep.subr.bf16.mxu1 %v2445_v18  ;;  %v2027_v18 = vpop.f32.mrb[29].mxu0 }
 0x356   :  { %2041 = vmatpush3.bf16.msra.mxu1 %v2451_v19  ;;  %v2028_v19 = vadd.f32 %v2027_v18, %v2026_v15 }
 0x357   :  { %2042 = vmatprep.subr.bf16.mxu1 %v2469_v22  ;;  %v2029_v22 = vpop.f32.mrb[30].mxu0 }
 0x35a   :  { %2043 = vmatpush3.bf16.msra.mxu1 %v2475_v23  ;;  %v2030_v23 = vpop.f32.mrb[31].mxu0 }
 0x35b   :  { %2044 = vmatprep.subr.bf16.mxu1 %v3028_v3  ;;  %v2070_v25 = vpop.f32.mrb[32].mxu0 }
 0x35c   :  { %v2071_v28 = vpop.f32.mrb[33].mxu0 }
 0x35d   :  { %v2073_v30 = vpop.f32.mrb[34].mxu0  ;;  %v2072_v37 = vadd.f32 %v2071_v28, %v2070_v25 }
 0x35e   :  { %2045 = vmatpush3.bf16.msra.mxu1 %v3029_v6  ;;  %v2074_v3 = vpop.f32.mrb[35].mxu0  ;;  %v2252_v6 = vld [vmem:[%s3002_s3 + $0x30] sm:$0xff]  }
 0x35f   :  { %2046 = vmatprep.subr.bf16.mxu1 %v3030_v7  ;;  %v2253_v7 = vld [vmem:[%s3002_s3 + $0x38] sm:$0xff]  }
 0x362   :  { %2047 = vmatpush3.bf16.msra.mxu1 %v3031_v11 }
 0x363   :  { %2139 = vmatprep.subr.bf16.mxu1 %v3027_v31 }
 0x365   :  { %1423 = vmatmul.mubr.bf16.vlgmr.msra.gmra.mrb[24].mxu1 %v1338_v24 }
 0x366   :  { %2140 = vmatpush3.bf16.msra.mxu1 %v3032_v33  ;;  %2143 = vmatprep.mubr.msk.bf16.mxu1 %vm2293_vm0, %v3027_v31  ;;  %v1385_v33 = vadd.f32 %v2028_v19, %v2716_v43  ;;  %v2255_v43 = vld [vmem:[%s3004_s5 + $0x8] sm:$0xff]  }
 0x367   :  { %2141 = vmatprep.subr.bf16.mxu1 %v3027_v31 }
 0x36a   :  { %2142 = vmatpush3.bf16.msra.mxu1 %v3033_v45 }
 0x36b   :  { %2147 = vmatprep.subr.bf16.mxu1 %v3027_v31 }
 0x36d   :  { %2144 = vmatmul.mubr.msk.bf16.vlgmr.msra.gmra.mrb[28].mxu1 %vm492_vm1, %v1339_v14 }
 0x36e   :  { %2151 = vmatprep.mubr.msk.bf16.mxu1 %vm2293_vm0, %v3027_v31  ;;  %2148 = vmatpush3.bf16.msra.mxu1 %v2252_v6 }
 0x36f   :  { %2149 = vmatprep.subr.bf16.mxu1 %v3027_v31 }
 0x372   :  { %2150 = vmatpush3.bf16.msra.mxu1 %v2253_v7 }
 0x373   :  { %2155 = vmatprep.subr.bf16.mxu1 %v3027_v31 }
 0x438   :  { %v2048_v10 = vpop.f32.mrb[24].mxu1 }
 0x439   :  { %v2049_v11 = vpop.f32.mrb[25].mxu1 }
 0x43a   :  { %v2050_v49 = vadd.f32 %v2049_v11, %v2048_v10  ;;  %v2051_v45 = vpop.f32.mrb[26].mxu1 }
 0x43b   :  { %v2052_v51 = vpop.f32.mrb[27].mxu1 }
 0x43c   :  { %v1425_v34 = vadd.f32 %v2050_v49, %v1385_v33 }
 0x43e   :  { %v1465_v38 = vadd.f32 %v2072_v37, %v1425_v34 }
 0x440   :  { %v1504_v36 = vpop.f32.mrb[28].mxu1 }
 0x441   :  { %v1505_v52 = vadd.f32 %v1504_v36, %v1465_v38  ;;  %v2145_v39 = vpop.f32.mrb[29].mxu1 }
 0x442   :  { %v1507_v40 = vpop.f32.mrb[30].mxu1 }
 0x443   :  { %v1510_v35 = vmax.f32 %v1505_v52, 0.0  ;;  %v2146_v26 = vpop.f32.mrb[31].mxu1 }
 0x445   :  { %v1511_v46 = vpack.c.bf16 %v1510_v35, %v1510_v35 }
 0x447   :  { %2152 = vmatmul.mubr.msk.bf16.vlgmr.msra.gmra.mrb[4].mxu1 %vm492_vm1, %v1511_v46 }
 0x448   :  { %2156 = vmatpush3.bf16.msra.mxu1 %v2254_v27  ;;  %2171 = vmatprep.mubr.msk.bf16.mxu1 %vm2293_vm0, %v3027_v31 }
 0x449   :  { %2157 = vmatprep.subr.bf16.mxu1 %v3027_v31 }
 0x44c   :  { %2158 = vmatpush3.bf16.msra.mxu1 %v2255_v43 }
 0x44d   :  { %2159 = vmatprep.subr.bf16.mxu1 %v3027_v31 }
 0x450   :  { %2160 = vmatpush3.bf16.msra.mxu1 %v2256_v47 }
 0x451   :  { %2161 = vmatprep.subr.bf16.mxu1 %v3027_v31 }
 0x454   :  { %2162 = vmatpush3.bf16.msra.mxu1 %v2257_v42 }
 0x455   :  { %2163 = vmatprep.subr.bf16.mxu1 %v3027_v31 }
 0x458   :  { %2164 = vmatpush3.bf16.msra.mxu1 %v2258_v44 }
 0x459   :  { %2165 = vmatprep.subr.bf16.mxu1 %v3027_v31 }
 0x45c   :  { %2166 = vmatpush3.bf16.msra.mxu1 %v2259_v0 }
 0x45d   :  { %2167 = vmatprep.subr.bf16.mxu1 %v3027_v31 }
 0x460   :  { %2168 = vmatpush3.bf16.msra.mxu1 %v2260_v1 }
 0x461   :  { %2169 = vmatprep.subr.bf16.mxu1 %v3027_v31  ;;  %v1785_v31 = vld [vmem:[%s3005_s6] ss:$0 sm:$0xff] }
 0x464   :  { %2170 = vmatpush3.bf16.msra.mxu1 %v2261_v4 }
 0x51a   :  { %v1566_v48 = vpop.f32.mrb[4].mxu1 }
 0x51b   :  { %v2175_v50 = vadd.f32 %v1757_v2, %v1566_v48  ;;  %v2153_v53 = vpop.f32.mrb[5].mxu1 }
 0x51c   :  { %v1569_v54 = vpop.f32.mrb[6].mxu1 }
 0x51d   :  { %v1573_v55 = vmax.f32 %v2175_v50, 0.0  ;;  %v2154_v56 = vpop.f32.mrb[7].mxu1 }
 0x51f   :  { %v1574_v57 = vpack.c.bf16 %v1573_v55, %v1573_v55 }
 0x521   :  { %2172 = vmatmul.mubr.bf16.vlgmr.msra.gmra.mrb[32].mxu1 %v1574_v57 }
 0x5f4   :  { %v1680_v58 = vpop.f32.mrb[32].mxu1 }
 0x5f5   :  { %v1681_v59 = vadd.f32 %v1785_v31, %v1680_v58  ;;  %v2173_v60 = vpop.f32.mrb[33].mxu1 }
 0x5f6   :  { %v1683_v61 = vpop.f32.mrb[34].mxu1 }
 0x5f7   :  { %v2174_v62 = vpop.f32.mrb[35].mxu1  ;;  %1687 = vst.msk [vmem:[#allocation2] sm:$0x3] %vm1686_vm2, %v1681_v59 }
 0x5f8   :  { %2278 = shalt.err (!%p2275_p4)
}
 0x5f9   :  { %s2279_s6 = scalar_lea.hbm %s3006_s7, 32 }
 0x5fa   :  { %p2280_p5 = scmp.ne.s32.totalorder %s3006_s7, %s2279_s6  ;;  %p2283_p6 = scmp.lt.u32.totalorder %s2279_s6, %s3006_s7 }
 0x5fc   :  { %p2285_p7 = pnand %p2283_p6, %p2280_p5 }
 0x5fe   :  { %2288 = shalt.err (!%p2285_p7)
}
 0x5ff   :  { %1697 = dma.vmem_to_hbm [thread:$0]  %s1695_s14, 32, %s3006_s7, [#allocation3]  }
 0x600   :  { %2289 = dma.done.wait [#allocation3], 32  }
 0x601   :  { %2290 = vsyncadd [#allocation3], 4294967264 }
 0x602   :  { %1701 = vsyncpa [#allocation3], 1 }

</bundles_post_ra>
